<compile_context>
chip_gen: v7x
topology: tpu7x:2x2x1
jax: 0.10.0
libtpu: 0.0.40
codegen_flags: <defaults>
</compile_context>

<pallas_src>
import numpy as np

import jax
import jax.numpy as jnp
from jax.experimental import pallas as pl
from jax.experimental.pallas import tpu as pltpu

IMAGE_CHANNEL = 1
INITIAL_CHANNEL = 4
Z_DIM = 16
H_DIM = 8 * 7 * 7          # 392
BATCH = 2
K = 4                      # conv kernel size everywhere

VMEM = pl.BlockSpec(memory_space=pltpu.MemorySpace.VMEM)


# ----------------------------------------------------------------------------
# The single fused Pallas kernel
#
# In-kernel activation layout for the conv stages:
#   rows  = spatial_y * BATCH + b          (y-major, batch interleaved)
#   lanes = spatial_x * C     + c          (x-major, channel minor)
# The raw input is fed batch-major (b*28 + iy); the first layer's S matrices
# perform the batch interleave, and the last layer uses per-batch S matrices so
# the reconstruction is written directly as (B, 1, 28, 28).
# ----------------------------------------------------------------------------
def _vae_fused_kernel(
    x_ref, eps_ref,
    s1_ref, n1_ref, b1_ref,          # encoder conv1 (BN folded)
    s2_ref, n2_ref, b2_ref,          # encoder conv2 (BN folded)
    w12_ref, b12_ref,                # fc1 || fc2 fused, flatten-permuted
    w3_ref, fb3_ref,                 # fc3, unflatten-permuted
    sd1_ref, nd1_ref, bd1_ref,       # decoder convT1 (BN folded)
    sd2_ref, nd2_ref, bd2_ref,       # decoder convT2
    recon_ref, mu_ref, lv_ref,       # outputs
    a2_scr, ml_scr, h3_scr, a3_scr,  # VMEM scratch
):
    f32 = jnp.float32

    def conv_taps(a, s_ref, n_ref):
        """sum_k (S_k @ A) @ N_k  -- one conv / transposed-conv layer."""
        acc = None
        for k in range(K):
            t = jnp.dot(s_ref[k, :, :], a, preferred_element_type=f32)
            u = jnp.dot(t, n_ref[k, :, :], preferred_element_type=f32)
            acc = u if acc is None else acc + u
        return acc

    # ---------------- encoder ----------------
    x0 = x_ref[...]                                                   # (56, 28)
    a1 = jnp.maximum(conv_taps(x0, s1_ref, n1_ref) + b1_ref[...], 0.0)   # (28, 56)
    a2_scr[...] = jnp.maximum(conv_taps(a1, s2_ref, n2_ref) + b2_ref[...], 0.0)  # (14, 56)

    # ---------------- bottleneck: fused fc1/fc2, clamp, reparameterize ----------------
    acc = jnp.dot(a2_scr[0:BATCH, :], w12_ref[0, :, :], preferred_element_type=f32)
    for y in range(1, 7):
        acc = acc + jnp.dot(a2_scr[y * BATCH:(y + 1) * BATCH, :],
                            w12_ref[y, :, :], preferred_element_type=f32)
    ml_scr[...] = acc + b12_ref[...]                                  # (2, 32) = mu || logvar

    mu = ml_scr[:, 0:Z_DIM]
    lv = jnp.clip(ml_scr[:, Z_DIM:2 * Z_DIM], -4.0, 4.0)
    z = mu + jnp.exp(0.5 * lv) * eps_ref[...]
    mu_ref[...] = mu
    lv_ref[...] = lv

    # ---------------- decoder: fc3 + ReLU + unflatten ----------------
    h3_scr[...] = jnp.maximum(
        jnp.dot(z, w3_ref[...], preferred_element_type=f32) + fb3_ref[...], 0.0)  # (2, 392)
    for y in range(7):                                # unflatten into (y,b) x (x,c) layout
        a3_scr[y * BATCH:(y + 1) * BATCH, :] = h3_scr[:, y * 56:(y + 1) * 56]

    a4 = jnp.maximum(conv_taps(a3_scr[...], sd1_ref, nd1_ref) + bd1_ref[...], 0.0)  # (28, 56)

    # ---------------- decoder convT2 + stable sigmoid, per-batch output slabs ----------------
    for b in range(BATCH):
        acc = None
        for k in range(K):
            t = jnp.dot(sd2_ref[b, k, :, :], a4, preferred_element_type=f32)
            u = jnp.dot(t, nd2_ref[k, :, :], preferred_element_type=f32)
            acc = u if acc is None else acc + u
        yv = acc + bd2_ref[...]                                       # (28, 28)
        recon_ref[b, 0, :, :] = 0.5 * (jnp.tanh(0.5 * yv) + 1.0)      # sigmoid, stable


def vae_forward(x_nchw, ops, eps):
    """x_nchw: (B, 1, 28, 28) f32; ops: precomputed operands; eps: (B, 16) noise."""
    x2d = x_nchw.reshape(BATCH * 28, 28)   # free row-major reshape (batch-major rows)

    out_shape = (
        jax.ShapeDtypeStruct((BATCH, 1, 28, 28), jnp.float32),   # recon
        jax.ShapeDtypeStruct((BATCH, Z_DIM), jnp.float32),       # mu
        jax.ShapeDtypeStruct((BATCH, Z_DIM), jnp.float32),       # logvar
    )
    inputs = (
        x2d, eps,
        ops["s1"], ops["n1"], ops["b1"],
        ops["s2"], ops["n2"], ops["b2"],
        ops["w12"], ops["b12"],
        ops["w3"], ops["fb3"],
        ops["sd1"], ops["nd1"], ops["bd1"],
        ops["sd2"], ops["nd2"], ops["bd2"],
    )
    return pl.pallas_call(
        _vae_fused_kernel,
        out_shape=out_shape,
        in_specs=[VMEM] * len(inputs),
        out_specs=(VMEM, VMEM, VMEM),
        scratch_shapes=[
            pltpu.VMEM((7 * BATCH, 56), jnp.float32),       # a2 (encoder output)
            pltpu.VMEM((BATCH, 2 * Z_DIM), jnp.float32),    # mu || logvar
            pltpu.VMEM((BATCH, H_DIM), jnp.float32),        # fc3 output (permuted)
            pltpu.VMEM((7 * BATCH, 56), jnp.float32),       # decoder unflatten
        ],
    )(*inputs)


# ----------------------------------------------------------------------------
# Init-time (host) construction of the fused operands
# ----------------------------------------------------------------------------
def _bn_fold(bn, eps=1e-5):
    scale = bn["gamma"] / np.sqrt(bn["var"] + eps)
    shift = bn["beta"] - bn["mean"] * scale
    return scale, shift


def _tap_selectors(h_in, h_out, stride, pad, transposed):
    """K per-tap 0/1 selection matrices R[k] of shape (h_out, h_in)."""
    mats = []
    for k in range(K):
        m = np.zeros((h_out, h_in), np.float32)
        if not transposed:
            for o in range(h_out):
                i = stride * o + k - pad
                if 0 <= i < h_in:
                    m[o, i] = 1.0
        else:
            for i in range(h_in):
                o = stride * i + k - pad
                if 0 <= o < h_out:
                    m[o, i] = 1.0
        mats.append(m)
    return mats


def _rows_first(r):
    """(h_out,h_in) -> (h_out*B, B*h_in): output rows (oy,b), input rows batch-major (b,iy)."""
    h_out, h_in = r.shape
    s = np.zeros((h_out, BATCH, BATCH, h_in), np.float32)
    for b in range(BATCH):
        s[:, b, b, :] = r
    return s.reshape(h_out * BATCH, BATCH * h_in)


def _rows_inter(r):
    """(h_out,h_in) -> (h_out*B, h_in*B): (y,b)-interleaved rows on both sides."""
    return np.kron(r, np.eye(BATCH, dtype=np.float32))


def _rows_last(r, b):
    """(h_out,h_in) -> (h_out, h_in*B): pick batch b from (y,b)-interleaved input rows."""
    h_out, h_in = r.shape
    s = np.zeros((h_out, h_in, BATCH), np.float32)
    s[:, :, b] = r
    return s.reshape(h_out, h_in * BATCH)


def _lane_mixers(rx, w_eff):
    """rx: K matrices (w_out, w_in); w_eff: (K, K, C_in, C_out)
    -> (K, w_in*C_in, w_out*C_out) with lane order (x, c)."""
    w_out, w_in = rx[0].shape
    c_in, c_out = w_eff.shape[2], w_eff.shape[3]
    out = np.zeros((K, w_in * c_in, w_out * c_out), np.float32)
    for ky in range(K):
        acc = np.zeros((w_in, c_in, w_out, c_out), np.float32)
        for kx in range(K):
            acc += np.einsum("oi,cd->icod", rx[kx], w_eff[ky, kx])
        out[ky] = acc.reshape(w_in * c_in, w_out * c_out)
    return out


def _bias_row(bias_eff, w_out):
    return np.tile(np.asarray(bias_eff, np.float32), w_out).reshape(1, -1)


def prepare_operands(params):
    p = jax.tree_util.tree_map(lambda a: np.asarray(a, np.float32), params)
    ops = {}

    # encoder Conv2d(1 -> 4, k=4, s=2, p=1), 28 -> 14, + BN(4) folded
    r1 = _tap_selectors(28, 14, 2, 1, transposed=False)
    sc1, sh1 = _bn_fold(p["bn1"])
    w_eff = np.transpose(p["ec1_w"], (2, 3, 1, 0)) * sc1[None, None, None, :]
    ops["s1"] = np.stack([_rows_first(r) for r in r1], 0)              # (4, 28, 56)
    ops["n1"] = _lane_mixers(r1, w_eff)                                # (4, 28, 56)
    ops["b1"] = _bias_row(p["ec1_b"] * sc1 + sh1, 14)                  # (1, 56)

    # encoder Conv2d(4 -> 8, k=4, s=2, p=1), 14 -> 7, + BN(8) folded
    r2 = _tap_selectors(14, 7, 2, 1, transposed=False)
    sc2, sh2 = _bn_fold(p["bn2"])
    w_eff = np.transpose(p["ec2_w"], (2, 3, 1, 0)) * sc2[None, None, None, :]
    ops["s2"] = np.stack([_rows_inter(r) for r in r2], 0)              # (4, 14, 28)
    ops["n2"] = _lane_mixers(r2, w_eff)                                # (4, 56, 56)
    ops["b2"] = _bias_row(p["ec2_b"] * sc2 + sh2, 7)                   # (1, 56)

    # PyTorch NCHW flatten permutation: position (y, x, c) <- feature index c*49 + y*7 + x
    yy, xx, cc = np.meshgrid(np.arange(7), np.arange(7), np.arange(8), indexing="ij")
    idx = (cc * 49 + yy * 7 + xx).reshape(-1)                          # (392,)

    # fc1 || fc2 fused into one GEMM, rows permuted to the in-kernel (y, x*8+c) layout
    w12 = np.concatenate([p["fc1_w"], p["fc2_w"]], axis=1)             # (392, 32)
    ops["w12"] = w12[idx].reshape(7, 56, 2 * Z_DIM)                    # (7, 56, 32)
    ops["b12"] = np.concatenate([p["fc1_b"], p["fc2_b"]])[None, :]     # (1, 32)

    # fc3, columns permuted so its output lane order is (y, x, c)
    ops["w3"] = p["fc3_w"][:, idx]                                     # (16, 392)
    ops["fb3"] = p["fc3_b"][idx][None, :]                              # (1, 392)

    # decoder ConvTranspose2d(8 -> 4, k=4, s=2, p=1), 7 -> 14, + BN(4) folded
    r3 = _tap_selectors(7, 14, 2, 1, transposed=True)
    sc3, sh3 = _bn_fold(p["bn3"])
    w_eff = np.transpose(p["dc1_w"], (2, 3, 0, 1)) * sc3[None, None, None, :]
    ops["sd1"] = np.stack([_rows_inter(r) for r in r3], 0)             # (4, 28, 14)
    ops["nd1"] = _lane_mixers(r3, w_eff)                               # (4, 56, 56)
    ops["bd1"] = _bias_row(p["dc1_b"] * sc3 + sh3, 14)                 # (1, 56)

    # decoder ConvTranspose2d(4 -> 1, k=4, s=2, p=1), 14 -> 28, per-batch row selectors
    r4 = _tap_selectors(14, 28, 2, 1, transposed=True)
    w_eff = np.transpose(p["dc2_w"], (2, 3, 0, 1))                     # (4, 4, 4, 1)
    ops["sd2"] = np.stack(
        [np.stack([_rows_last(r, b) for r in r4], 0) for b in range(BATCH)], 0)  # (2,4,28,28)
    ops["nd2"] = _lane_mixers(r4, w_eff)                               # (4, 56, 28)
    ops["bd2"] = _bias_row(p["dc2_b"], 28)                             # (1, 28)

    return {k: jnp.asarray(v) for k, v in ops.items()}


# ----------------------------------------------------------------------------
# Synthetic, deterministic parameters in PyTorch layouts
# ----------------------------------------------------------------------------
def init_params(key):
    ks = iter(jax.random.split(key, 32))

    def nrm(shape, s=0.1):
        return s * jax.random.normal(next(ks), shape, dtype=jnp.float32)

    def uni(shape, lo, hi):
        return jax.random.uniform(next(ks), shape, jnp.float32, lo, hi)

    def bn(ch):
        return dict(gamma=uni((ch,), 0.5, 1.5), beta=nrm((ch,)),
                    mean=nrm((ch,)), var=uni((ch,), 0.5, 1.5))

    p = {}
    p["ec1_w"], p["ec1_b"], p["bn1"] = nrm((4, 1, 4, 4)), nrm((4,)), bn(4)   # Conv2d(1,4)
    p["ec2_w"], p["ec2_b"], p["bn2"] = nrm((8, 4, 4, 4)), nrm((8,)), bn(8)   # Conv2d(4,8)
    p["fc1_w"], p["fc1_b"] = nrm((H_DIM, Z_DIM)), nrm((Z_DIM,))              # (in, out)
    p["fc2_w"], p["fc2_b"] = nrm((H_DIM, Z_DIM)), nrm((Z_DIM,))
    p["fc3_w"], p["fc3_b"] = nrm((Z_DIM, H_DIM)), nrm((H_DIM,))
    p["dc1_w"], p["dc1_b"], p["bn3"] = nrm((8, 4, 4, 4)), nrm((4,)), bn(4)   # ConvT(8,4)
    p["dc2_w"], p["dc2_b"] = nrm((4, 1, 4, 4)), nrm((1,))                    # ConvT(4,1)
    return p


if __name__ == "__main__":
    key = jax.random.PRNGKey(0)
    kx, keps, kp = jax.random.split(key, 3)

    x = jax.random.normal(kx, (BATCH, IMAGE_CHANNEL, 28, 28), jnp.float32)
    eps = jax.random.normal(keps, (BATCH, Z_DIM), jnp.float32)   # reparameterization noise
    params = init_params(kp)
    ops = prepare_operands(params)

    fwd = jax.jit(vae_forward)
    recon, mu, logvar = fwd(x, ops, eps)
    jax.block_until_ready((recon, mu, logvar))

    assert recon.shape == (BATCH, 1, 28, 28) and recon.dtype == jnp.float32
    assert mu.shape == (BATCH, Z_DIM) and logvar.shape == (BATCH, Z_DIM)
    assert bool(jnp.all(jnp.isfinite(recon)))
    assert bool(jnp.all((recon >= 0.0) & (recon <= 1.0)))
    assert bool(jnp.all((logvar >= -4.0) & (logvar <= 4.0)))
    print("KERNEL_OK")
</pallas_src>

<mosaic_0001>
module attributes {stable_mosaic.version = 11 : i64} {
  func.func @_vae_fused_kernel(%arg0: memref<56x28xf32, #tpu.memory_space<vmem>>, %arg1: memref<2x16xf32, #tpu.memory_space<vmem>>, %arg2: memref<4x28x56xf32, #tpu.memory_space<vmem>>, %arg3: memref<4x28x56xf32, #tpu.memory_space<vmem>>, %arg4: memref<1x56xf32, #tpu.memory_space<vmem>>, %arg5: memref<4x14x28xf32, #tpu.memory_space<vmem>>, %arg6: memref<4x56x56xf32, #tpu.memory_space<vmem>>, %arg7: memref<1x56xf32, #tpu.memory_space<vmem>>, %arg8: memref<7x56x32xf32, #tpu.memory_space<vmem>>, %arg9: memref<1x32xf32, #tpu.memory_space<vmem>>, %arg10: memref<16x392xf32, #tpu.memory_space<vmem>>, %arg11: memref<1x392xf32, #tpu.memory_space<vmem>>, %arg12: memref<4x28x14xf32, #tpu.memory_space<vmem>>, %arg13: memref<4x56x56xf32, #tpu.memory_space<vmem>>, %arg14: memref<1x56xf32, #tpu.memory_space<vmem>>, %arg15: memref<2x4x28x28xf32, #tpu.memory_space<vmem>>, %arg16: memref<4x56x28xf32, #tpu.memory_space<vmem>>, %arg17: memref<1x28xf32, #tpu.memory_space<vmem>>, %arg18: memref<2x1x28x28xf32, #tpu.memory_space<vmem>>, %arg19: memref<2x16xf32, #tpu.memory_space<vmem>>, %arg20: memref<2x16xf32, #tpu.memory_space<vmem>>, %arg21: memref<14x56xf32, #tpu.memory_space<vmem>>, %arg22: memref<2x32xf32, #tpu.memory_space<vmem>>, %arg23: memref<2x392xf32, #tpu.memory_space<vmem>>, %arg24: memref<14x56xf32, #tpu.memory_space<vmem>>) attributes {dimension_semantics = [], scalar_prefetch = 0 : i64, scratch_operands = 4 : i64, tpu.core_type = #tpu.core_type<tc>} {
    %c0 = arith.constant 0 : index
    %c0_0 = arith.constant 0 : index
    %0 = vector.load %arg0[%c0, %c0_0] : memref<56x28xf32, #tpu.memory_space<vmem>>, vector<56x28xf32>
    %c0_1 = arith.constant 0 : index
    %c0_2 = arith.constant 0 : index
    %c0_3 = arith.constant 0 : index
    %1 = vector.load %arg2[%c0_1, %c0_2, %c0_3] : memref<4x28x56xf32, #tpu.memory_space<vmem>>, vector<1x28x56xf32>
    %2 = vector.shape_cast %1 : vector<1x28x56xf32> to vector<28x56xf32>
    %cst = arith.constant dense<0.000000e+00> : vector<28x28xf32>
    %3 = tpu.matmul %2, %0, %cst {dimension_numbers = #tpu.dot_dimension_numbers<[1], [0], [0], [1], [0, 0, 1, 1], [], []>} : vector<28x56xf32>, vector<56x28xf32>, vector<28x28xf32> -> vector<28x28xf32>
    %c0_4 = arith.constant 0 : index
    %c0_5 = arith.constant 0 : index
    %c0_6 = arith.constant 0 : index
    %4 = vector.load %arg3[%c0_4, %c0_5, %c0_6] : memref<4x28x56xf32, #tpu.memory_space<vmem>>, vector<1x28x56xf32>
    %5 = vector.shape_cast %4 : vector<1x28x56xf32> to vector<28x56xf32>
    %cst_7 = arith.constant dense<0.000000e+00> : vector<28x56xf32>
    %6 = tpu.matmul %3, %5, %cst_7 {dimension_numbers = #tpu.dot_dimension_numbers<[1], [0], [0], [1], [0, 0, 1, 1], [], []>} : vector<28x28xf32>, vector<28x56xf32>, vector<28x56xf32> -> vector<28x56xf32>
    %c1 = arith.constant 1 : index
    %c0_8 = arith.constant 0 : index
    %c0_9 = arith.constant 0 : index
    %7 = vector.load %arg2[%c1, %c0_8, %c0_9] : memref<4x28x56xf32, #tpu.memory_space<vmem>>, vector<1x28x56xf32>
    %8 = vector.shape_cast %7 : vector<1x28x56xf32> to vector<28x56xf32>
    %cst_10 = arith.constant dense<0.000000e+00> : vector<28x28xf32>
    %9 = tpu.matmul %8, %0, %cst_10 {dimension_numbers = #tpu.dot_dimension_numbers<[1], [0], [0], [1], [0, 0, 1, 1], [], []>} : vector<28x56xf32>, vector<56x28xf32>, vector<28x28xf32> -> vector<28x28xf32>
    %c1_11 = arith.constant 1 : index
    %c0_12 = arith.constant 0 : index
    %c0_13 = arith.constant 0 : index
    %10 = vector.load %arg3[%c1_11, %c0_12, %c0_13] : memref<4x28x56xf32, #tpu.memory_space<vmem>>, vector<1x28x56xf32>
    %11 = vector.shape_cast %10 : vector<1x28x56xf32> to vector<28x56xf32>
    %cst_14 = arith.constant dense<0.000000e+00> : vector<28x56xf32>
    %12 = tpu.matmul %9, %11, %cst_14 {dimension_numbers = #tpu.dot_dimension_numbers<[1], [0], [0], [1], [0, 0, 1, 1], [], []>} : vector<28x28xf32>, vector<28x56xf32>, vector<28x56xf32> -> vector<28x56xf32>
    %13 = arith.addf %6, %12 : vector<28x56xf32>
    %c2 = arith.constant 2 : index
    %c0_15 = arith.constant 0 : index
    %c0_16 = arith.constant 0 : index
    %14 = vector.load %arg2[%c2, %c0_15, %c0_16] : memref<4x28x56xf32, #tpu.memory_space<vmem>>, vector<1x28x56xf32>
    %15 = vector.shape_cast %14 : vector<1x28x56xf32> to vector<28x56xf32>
    %cst_17 = arith.constant dense<0.000000e+00> : vector<28x28xf32>
    %16 = tpu.matmul %15, %0, %cst_17 {dimension_numbers = #tpu.dot_dimension_numbers<[1], [0], [0], [1], [0, 0, 1, 1], [], []>} : vector<28x56xf32>, vector<56x28xf32>, vector<28x28xf32> -> vector<28x28xf32>
    %c2_18 = arith.constant 2 : index
    %c0_19 = arith.constant 0 : index
    %c0_20 = arith.constant 0 : index
    %17 = vector.load %arg3[%c2_18, %c0_19, %c0_20] : memref<4x28x56xf32, #tpu.memory_space<vmem>>, vector<1x28x56xf32>
    %18 = vector.shape_cast %17 : vector<1x28x56xf32> to vector<28x56xf32>
    %cst_21 = arith.constant dense<0.000000e+00> : vector<28x56xf32>
    %19 = tpu.matmul %16, %18, %cst_21 {dimension_numbers = #tpu.dot_dimension_numbers<[1], [0], [0], [1], [0, 0, 1, 1], [], []>} : vector<28x28xf32>, vector<28x56xf32>, vector<28x56xf32> -> vector<28x56xf32>
    %20 = arith.addf %13, %19 : vector<28x56xf32>
    %c3 = arith.constant 3 : index
    %c0_22 = arith.constant 0 : index
    %c0_23 = arith.constant 0 : index
    %21 = vector.load %arg2[%c3, %c0_22, %c0_23] : memref<4x28x56xf32, #tpu.memory_space<vmem>>, vector<1x28x56xf32>
    %22 = vector.shape_cast %21 : vector<1x28x56xf32> to vector<28x56xf32>
    %cst_24 = arith.constant dense<0.000000e+00> : vector<28x28xf32>
    %23 = tpu.matmul %22, %0, %cst_24 {dimension_numbers = #tpu.dot_dimension_numbers<[1], [0], [0], [1], [0, 0, 1, 1], [], []>} : vector<28x56xf32>, vector<56x28xf32>, vector<28x28xf32> -> vector<28x28xf32>
    %c3_25 = arith.constant 3 : index
    %c0_26 = arith.constant 0 : index
    %c0_27 = arith.constant 0 : index
    %24 = vector.load %arg3[%c3_25, %c0_26, %c0_27] : memref<4x28x56xf32, #tpu.memory_space<vmem>>, vector<1x28x56xf32>
    %25 = vector.shape_cast %24 : vector<1x28x56xf32> to vector<28x56xf32>
    %cst_28 = arith.constant dense<0.000000e+00> : vector<28x56xf32>
    %26 = tpu.matmul %23, %25, %cst_28 {dimension_numbers = #tpu.dot_dimension_numbers<[1], [0], [0], [1], [0, 0, 1, 1], [], []>} : vector<28x28xf32>, vector<28x56xf32>, vector<28x56xf32> -> vector<28x56xf32>
    %27 = arith.addf %20, %26 : vector<28x56xf32>
    %c0_29 = arith.constant 0 : index
    %c0_30 = arith.constant 0 : index
    %28 = vector.load %arg4[%c0_29, %c0_30] : memref<1x56xf32, #tpu.memory_space<vmem>>, vector<1x56xf32>
    %29 = vector.broadcast %28 : vector<1x56xf32> to vector<28x56xf32>
    %30 = arith.addf %27, %29 : vector<28x56xf32>
    %cst_31 = arith.constant 0.000000e+00 : f32
    %31 = vector.broadcast %cst_31 : f32 to vector<28x56xf32>
    %32 = arith.maximumf %30, %31 : vector<28x56xf32>
    %c0_32 = arith.constant 0 : index
    %c0_33 = arith.constant 0 : index
    %c0_34 = arith.constant 0 : index
    %33 = vector.load %arg5[%c0_32, %c0_33, %c0_34] : memref<4x14x28xf32, #tpu.memory_space<vmem>>, vector<1x14x28xf32>
    %34 = vector.shape_cast %33 : vector<1x14x28xf32> to vector<14x28xf32>
    %cst_35 = arith.constant dense<0.000000e+00> : vector<14x56xf32>
    %35 = tpu.matmul %34, %32, %cst_35 {dimension_numbers = #tpu.dot_dimension_numbers<[1], [0], [0], [1], [0, 0, 1, 1], [], []>} : vector<14x28xf32>, vector<28x56xf32>, vector<14x56xf32> -> vector<14x56xf32>
    %c0_36 = arith.constant 0 : index
    %c0_37 = arith.constant 0 : index
    %c0_38 = arith.constant 0 : index
    %36 = vector.load %arg6[%c0_36, %c0_37, %c0_38] : memref<4x56x56xf32, #tpu.memory_space<vmem>>, vector<1x56x56xf32>
    %37 = vector.shape_cast %36 : vector<1x56x56xf32> to vector<56x56xf32>
    %cst_39 = arith.constant dense<0.000000e+00> : vector<14x56xf32>
    %38 = tpu.matmul %35, %37, %cst_39 {dimension_numbers = #tpu.dot_dimension_numbers<[1], [0], [0], [1], [0, 0, 1, 1], [], []>} : vector<14x56xf32>, vector<56x56xf32>, vector<14x56xf32> -> vector<14x56xf32>
    %c1_40 = arith.constant 1 : index
    %c0_41 = arith.constant 0 : index
    %c0_42 = arith.constant 0 : index
    %39 = vector.load %arg5[%c1_40, %c0_41, %c0_42] : memref<4x14x28xf32, #tpu.memory_space<vmem>>, vector<1x14x28xf32>
    %40 = vector.shape_cast %39 : vector<1x14x28xf32> to vector<14x28xf32>
    %cst_43 = arith.constant dense<0.000000e+00> : vector<14x56xf32>
    %41 = tpu.matmul %40, %32, %cst_43 {dimension_numbers = #tpu.dot_dimension_numbers<[1], [0], [0], [1], [0, 0, 1, 1], [], []>} : vector<14x28xf32>, vector<28x56xf32>, vector<14x56xf32> -> vector<14x56xf32>
    %c1_44 = arith.constant 1 : index
    %c0_45 = arith.constant 0 : index
    %c0_46 = arith.constant 0 : index
    %42 = vector.load %arg6[%c1_44, %c0_45, %c0_46] : memref<4x56x56xf32, #tpu.memory_space<vmem>>, vector<1x56x56xf32>
    %43 = vector.shape_cast %42 : vector<1x56x56xf32> to vector<56x56xf32>
    %cst_47 = arith.constant dense<0.000000e+00> : vector<14x56xf32>
    %44 = tpu.matmul %41, %43, %cst_47 {dimension_numbers = #tpu.dot_dimension_numbers<[1], [0], [0], [1], [0, 0, 1, 1], [], []>} : vector<14x56xf32>, vector<56x56xf32>, vector<14x56xf32> -> vector<14x56xf32>
    %45 = arith.addf %38, %44 : vector<14x56xf32>
    %c2_48 = arith.constant 2 : index
    %c0_49 = arith.constant 0 : index
    %c0_50 = arith.constant 0 : index
    %46 = vector.load %arg5[%c2_48, %c0_49, %c0_50] : memref<4x14x28xf32, #tpu.memory_space<vmem>>, vector<1x14x28xf32>
    %47 = vector.shape_cast %46 : vector<1x14x28xf32> to vector<14x28xf32>
    %cst_51 = arith.constant dense<0.000000e+00> : vector<14x56xf32>
    %48 = tpu.matmul %47, %32, %cst_51 {dimension_numbers = #tpu.dot_dimension_numbers<[1], [0], [0], [1], [0, 0, 1, 1], [], []>} : vector<14x28xf32>, vector<28x56xf32>, vector<14x56xf32> -> vector<14x56xf32>
    %c2_52 = arith.constant 2 : index
    %c0_53 = arith.constant 0 : index
    %c0_54 = arith.constant 0 : index
    %49 = vector.load %arg6[%c2_52, %c0_53, %c0_54] : memref<4x56x56xf32, #tpu.memory_space<vmem>>, vector<1x56x56xf32>
    %50 = vector.shape_cast %49 : vector<1x56x56xf32> to vector<56x56xf32>
    %cst_55 = arith.constant dense<0.000000e+00> : vector<14x56xf32>
    %51 = tpu.matmul %48, %50, %cst_55 {dimension_numbers = #tpu.dot_dimension_numbers<[1], [0], [0], [1], [0, 0, 1, 1], [], []>} : vector<14x56xf32>, vector<56x56xf32>, vector<14x56xf32> -> vector<14x56xf32>
    %52 = arith.addf %45, %51 : vector<14x56xf32>
    %c3_56 = arith.constant 3 : index
    %c0_57 = arith.constant 0 : index
    %c0_58 = arith.constant 0 : index
    %53 = vector.load %arg5[%c3_56, %c0_57, %c0_58] : memref<4x14x28xf32, #tpu.memory_space<vmem>>, vector<1x14x28xf32>
    %54 = vector.shape_cast %53 : vector<1x14x28xf32> to vector<14x28xf32>
    %cst_59 = arith.constant dense<0.000000e+00> : vector<14x56xf32>
    %55 = tpu.matmul %54, %32, %cst_59 {dimension_numbers = #tpu.dot_dimension_numbers<[1], [0], [0], [1], [0, 0, 1, 1], [], []>} : vector<14x28xf32>, vector<28x56xf32>, vector<14x56xf32> -> vector<14x56xf32>
    %c3_60 = arith.constant 3 : index
    %c0_61 = arith.constant 0 : index
    %c0_62 = arith.constant 0 : index
    %56 = vector.load %arg6[%c3_60, %c0_61, %c0_62] : memref<4x56x56xf32, #tpu.memory_space<vmem>>, vector<1x56x56xf32>
    %57 = vector.shape_cast %56 : vector<1x56x56xf32> to vector<56x56xf32>
    %cst_63 = arith.constant dense<0.000000e+00> : vector<14x56xf32>
    %58 = tpu.matmul %55, %57, %cst_63 {dimension_numbers = #tpu.dot_dimension_numbers<[1], [0], [0], [1], [0, 0, 1, 1], [], []>} : vector<14x56xf32>, vector<56x56xf32>, vector<14x56xf32> -> vector<14x56xf32>
    %59 = arith.addf %52, %58 : vector<14x56xf32>
    %c0_64 = arith.constant 0 : index
    %c0_65 = arith.constant 0 : index
    %60 = vector.load %arg7[%c0_64, %c0_65] : memref<1x56xf32, #tpu.memory_space<vmem>>, vector<1x56xf32>
    %61 = vector.broadcast %60 : vector<1x56xf32> to vector<14x56xf32>
    %62 = arith.addf %59, %61 : vector<14x56xf32>
    %cst_66 = arith.constant 0.000000e+00 : f32
    %63 = vector.broadcast %cst_66 : f32 to vector<14x56xf32>
    %64 = arith.maximumf %62, %63 : vector<14x56xf32>
    %c0_67 = arith.constant 0 : index
    %c0_68 = arith.constant 0 : index
    %65 = vector.load %arg21[%c0_67, %c0_68] : memref<14x56xf32, #tpu.memory_space<vmem>>, vector<14x56xf32>
    tpu.vector_store %arg21[%c0_67, %c0_68], %64 {strides = array<i32>} : memref<14x56xf32, #tpu.memory_space<vmem>>, vector<14x56xf32>,
    %c0_69 = arith.constant 0 : index
    %c0_70 = arith.constant 0 : index
    %66 = vector.load %arg21[%c0_69, %c0_70] : memref<14x56xf32, #tpu.memory_space<vmem>>, vector<2x56xf32>
    %c0_71 = arith.constant 0 : index
    %c0_72 = arith.constant 0 : index
    %c0_73 = arith.constant 0 : index
    %67 = vector.load %arg8[%c0_71, %c0_72, %c0_73] : memref<7x56x32xf32, #tpu.memory_space<vmem>>, vector<1x56x32xf32>
    %68 = vector.shape_cast %67 : vector<1x56x32xf32> to vector<56x32xf32>
    %cst_74 = arith.constant dense<0.000000e+00> : vector<2x32xf32>
    %69 = tpu.matmul %66, %68, %cst_74 {dimension_numbers = #tpu.dot_dimension_numbers<[1], [0], [0], [1], [0, 0, 1, 1], [], []>} : vector<2x56xf32>, vector<56x32xf32>, vector<2x32xf32> -> vector<2x32xf32>
    %c2_75 = arith.constant 2 : index
    %c0_76 = arith.constant 0 : index
    %70 = vector.load %arg21[%c2_75, %c0_76] : memref<14x56xf32, #tpu.memory_space<vmem>>, vector<2x56xf32>
    %c1_77 = arith.constant 1 : index
    %c0_78 = arith.constant 0 : index
    %c0_79 = arith.constant 0 : index
    %71 = vector.load %arg8[%c1_77, %c0_78, %c0_79] : memref<7x56x32xf32, #tpu.memory_space<vmem>>, vector<1x56x32xf32>
    %72 = vector.shape_cast %71 : vector<1x56x32xf32> to vector<56x32xf32>
    %cst_80 = arith.constant dense<0.000000e+00> : vector<2x32xf32>
    %73 = tpu.matmul %70, %72, %cst_80 {dimension_numbers = #tpu.dot_dimension_numbers<[1], [0], [0], [1], [0, 0, 1, 1], [], []>} : vector<2x56xf32>, vector<56x32xf32>, vector<2x32xf32> -> vector<2x32xf32>
    %74 = arith.addf %69, %73 : vector<2x32xf32>
    %c4 = arith.constant 4 : index
    %c0_81 = arith.constant 0 : index
    %75 = vector.load %arg21[%c4, %c0_81] : memref<14x56xf32, #tpu.memory_space<vmem>>, vector<2x56xf32>
    %c2_82 = arith.constant 2 : index
    %c0_83 = arith.constant 0 : index
    %c0_84 = arith.constant 0 : index
    %76 = vector.load %arg8[%c2_82, %c0_83, %c0_84] : memref<7x56x32xf32, #tpu.memory_space<vmem>>, vector<1x56x32xf32>
    %77 = vector.shape_cast %76 : vector<1x56x32xf32> to vector<56x32xf32>
    %cst_85 = arith.constant dense<0.000000e+00> : vector<2x32xf32>
    %78 = tpu.matmul %75, %77, %cst_85 {dimension_numbers = #tpu.dot_dimension_numbers<[1], [0], [0], [1], [0, 0, 1, 1], [], []>} : vector<2x56xf32>, vector<56x32xf32>, vector<2x32xf32> -> vector<2x32xf32>
    %79 = arith.addf %74, %78 : vector<2x32xf32>
    %c6 = arith.constant 6 : index
    %c0_86 = arith.constant 0 : index
    %80 = vector.load %arg21[%c6, %c0_86] : memref<14x56xf32, #tpu.memory_space<vmem>>, vector<2x56xf32>
    %c3_87 = arith.constant 3 : index
    %c0_88 = arith.constant 0 : index
    %c0_89 = arith.constant 0 : index
    %81 = vector.load %arg8[%c3_87, %c0_88, %c0_89] : memref<7x56x32xf32, #tpu.memory_space<vmem>>, vector<1x56x32xf32>
    %82 = vector.shape_cast %81 : vector<1x56x32xf32> to vector<56x32xf32>
    %cst_90 = arith.constant dense<0.000000e+00> : vector<2x32xf32>
    %83 = tpu.matmul %80, %82, %cst_90 {dimension_numbers = #tpu.dot_dimension_numbers<[1], [0], [0], [1], [0, 0, 1, 1], [], []>} : vector<2x56xf32>, vector<56x32xf32>, vector<2x32xf32> -> vector<2x32xf32>
    %84 = arith.addf %79, %83 : vector<2x32xf32>
    %c8 = arith.constant 8 : index
    %c0_91 = arith.constant 0 : index
    %85 = vector.load %arg21[%c8, %c0_91] : memref<14x56xf32, #tpu.memory_space<vmem>>, vector<2x56xf32>
    %c4_92 = arith.constant 4 : index
    %c0_93 = arith.constant 0 : index
    %c0_94 = arith.constant 0 : index
    %86 = vector.load %arg8[%c4_92, %c0_93, %c0_94] : memref<7x56x32xf32, #tpu.memory_space<vmem>>, vector<1x56x32xf32>
    %87 = vector.shape_cast %86 : vector<1x56x32xf32> to vector<56x32xf32>
    %cst_95 = arith.constant dense<0.000000e+00> : vector<2x32xf32>
    %88 = tpu.matmul %85, %87, %cst_95 {dimension_numbers = #tpu.dot_dimension_numbers<[1], [0], [0], [1], [0, 0, 1, 1], [], []>} : vector<2x56xf32>, vector<56x32xf32>, vector<2x32xf32> -> vector<2x32xf32>
    %89 = arith.addf %84, %88 : vector<2x32xf32>
    %c10 = arith.constant 10 : index
    %c0_96 = arith.constant 0 : index
    %90 = vector.load %arg21[%c10, %c0_96] : memref<14x56xf32, #tpu.memory_space<vmem>>, vector<2x56xf32>
    %c5 = arith.constant 5 : index
    %c0_97 = arith.constant 0 : index
    %c0_98 = arith.constant 0 : index
    %91 = vector.load %arg8[%c5, %c0_97, %c0_98] : memref<7x56x32xf32, #tpu.memory_space<vmem>>, vector<1x56x32xf32>
    %92 = vector.shape_cast %91 : vector<1x56x32xf32> to vector<56x32xf32>
    %cst_99 = arith.constant dense<0.000000e+00> : vector<2x32xf32>
    %93 = tpu.matmul %90, %92, %cst_99 {dimension_numbers = #tpu.dot_dimension_numbers<[1], [0], [0], [1], [0, 0, 1, 1], [], []>} : vector<2x56xf32>, vector<56x32xf32>, vector<2x32xf32> -> vector<2x32xf32>
    %94 = arith.addf %89, %93 : vector<2x32xf32>
    %c12 = arith.constant 12 : index
    %c0_100 = arith.constant 0 : index
    %95 = vector.load %arg21[%c12, %c0_100] : memref<14x56xf32, #tpu.memory_space<vmem>>, vector<2x56xf32>
    %c6_101 = arith.constant 6 : index
    %c0_102 = arith.constant 0 : index
    %c0_103 = arith.constant 0 : index
    %96 = vector.load %arg8[%c6_101, %c0_102, %c0_103] : memref<7x56x32xf32, #tpu.memory_space<vmem>>, vector<1x56x32xf32>
    %97 = vector.shape_cast %96 : vector<1x56x32xf32> to vector<56x32xf32>
    %cst_104 = arith.constant dense<0.000000e+00> : vector<2x32xf32>
    %98 = tpu.matmul %95, %97, %cst_104 {dimension_numbers = #tpu.dot_dimension_numbers<[1], [0], [0], [1], [0, 0, 1, 1], [], []>} : vector<2x56xf32>, vector<56x32xf32>, vector<2x32xf32> -> vector<2x32xf32>
    %99 = arith.addf %94, %98 : vector<2x32xf32>
    %c0_105 = arith.constant 0 : index
    %c0_106 = arith.constant 0 : index
    %100 = vector.load %arg9[%c0_105, %c0_106] : memref<1x32xf32, #tpu.memory_space<vmem>>, vector<1x32xf32>
    %101 = vector.broadcast %100 : vector<1x32xf32> to vector<2x32xf32>
    %102 = arith.addf %99, %101 : vector<2x32xf32>
    %c0_107 = arith.constant 0 : index
    %c0_108 = arith.constant 0 : index
    %103 = vector.load %arg22[%c0_107, %c0_108] : memref<2x32xf32, #tpu.memory_space<vmem>>, vector<2x32xf32>
    tpu.vector_store %arg22[%c0_107, %c0_108], %102 {strides = array<i32>} : memref<2x32xf32, #tpu.memory_space<vmem>>, vector<2x32xf32>,
    %c0_109 = arith.constant 0 : index
    %c0_110 = arith.constant 0 : index
    %104 = vector.load %arg22[%c0_109, %c0_110] : memref<2x32xf32, #tpu.memory_space<vmem>>, vector<2x16xf32>
    %c0_111 = arith.constant 0 : index
    %c16 = arith.constant 16 : index
    %105 = vector.load %arg22[%c0_111, %c16] : memref<2x32xf32, #tpu.memory_space<vmem>>, vector<2x16xf32>
    %cst_112 = arith.constant -4.000000e+00 : f32
    %cst_113 = arith.constant 4.000000e+00 : f32
    %106 = vector.broadcast %cst_112 : f32 to vector<2x16xf32>
    %107 = arith.maximumf %106, %105 : vector<2x16xf32>
    %108 = vector.broadcast %cst_113 : f32 to vector<2x16xf32>
    %109 = arith.minimumf %108, %107 : vector<2x16xf32>
    %cst_114 = arith.constant 5.000000e-01 : f32
    %110 = vector.broadcast %cst_114 : f32 to vector<2x16xf32>
    %111 = arith.mulf %110, %109 : vector<2x16xf32>
    %112 = math.exp %111 : vector<2x16xf32>
    %c0_115 = arith.constant 0 : index
    %c0_116 = arith.constant 0 : index
    %113 = vector.load %arg1[%c0_115, %c0_116] : memref<2x16xf32, #tpu.memory_space<vmem>>, vector<2x16xf32>
    %114 = arith.mulf %112, %113 : vector<2x16xf32>
    %115 = arith.addf %104, %114 : vector<2x16xf32>
    %c0_117 = arith.constant 0 : index
    %c0_118 = arith.constant 0 : index
    %116 = vector.load %arg19[%c0_117, %c0_118] : memref<2x16xf32, #tpu.memory_space<vmem>>, vector<2x16xf32>
    tpu.vector_store %arg19[%c0_117, %c0_118], %104 {strides = array<i32>} : memref<2x16xf32, #tpu.memory_space<vmem>>, vector<2x16xf32>,
    %c0_119 = arith.constant 0 : index
    %c0_120 = arith.constant 0 : index
    %117 = vector.load %arg20[%c0_119, %c0_120] : memref<2x16xf32, #tpu.memory_space<vmem>>, vector<2x16xf32>
    tpu.vector_store %arg20[%c0_119, %c0_120], %109 {strides = array<i32>} : memref<2x16xf32, #tpu.memory_space<vmem>>, vector<2x16xf32>,
    %c0_121 = arith.constant 0 : index
    %c0_122 = arith.constant 0 : index
    %118 = vector.load %arg10[%c0_121, %c0_122] : memref<16x392xf32, #tpu.memory_space<vmem>>, vector<16x392xf32>
    %cst_123 = arith.constant dense<0.000000e+00> : vector<2x392xf32>
    %119 = tpu.matmul %115, %118, %cst_123 {dimension_numbers = #tpu.dot_dimension_numbers<[1], [0], [0], [1], [0, 0, 1, 1], [], []>} : vector<2x16xf32>, vector<16x392xf32>, vector<2x392xf32> -> vector<2x392xf32>
    %c0_124 = arith.constant 0 : index
    %c0_125 = arith.constant 0 : index
    %120 = vector.load %arg11[%c0_124, %c0_125] : memref<1x392xf32, #tpu.memory_space<vmem>>, vector<1x392xf32>
    %121 = vector.broadcast %120 : vector<1x392xf32> to vector<2x392xf32>
    %122 = arith.addf %119, %121 : vector<2x392xf32>
    %cst_126 = arith.constant 0.000000e+00 : f32
    %123 = vector.broadcast %cst_126 : f32 to vector<2x392xf32>
    %124 = arith.maximumf %122, %123 : vector<2x392xf32>
    %c0_127 = arith.constant 0 : index
    %c0_128 = arith.constant 0 : index
    %125 = vector.load %arg23[%c0_127, %c0_128] : memref<2x392xf32, #tpu.memory_space<vmem>>, vector<2x392xf32>
    tpu.vector_store %arg23[%c0_127, %c0_128], %124 {strides = array<i32>} : memref<2x392xf32, #tpu.memory_space<vmem>>, vector<2x392xf32>,
    %c0_129 = arith.constant 0 : index
    %c0_130 = arith.constant 0 : index
    %126 = vector.load %arg23[%c0_129, %c0_130] : memref<2x392xf32, #tpu.memory_space<vmem>>, vector<2x56xf32>
    %c0_131 = arith.constant 0 : index
    %c0_132 = arith.constant 0 : index
    %127 = vector.load %arg24[%c0_131, %c0_132] : memref<14x56xf32, #tpu.memory_space<vmem>>, vector<2x56xf32>
    tpu.vector_store %arg24[%c0_131, %c0_132], %126 {strides = array<i32>} : memref<14x56xf32, #tpu.memory_space<vmem>>, vector<2x56xf32>,
    %c0_133 = arith.constant 0 : index
    %c56 = arith.constant 56 : index
    %128 = vector.load %arg23[%c0_133, %c56] : memref<2x392xf32, #tpu.memory_space<vmem>>, vector<2x56xf32>
    %c2_134 = arith.constant 2 : index
    %c0_135 = arith.constant 0 : index
    %129 = vector.load %arg24[%c2_134, %c0_135] : memref<14x56xf32, #tpu.memory_space<vmem>>, vector<2x56xf32>
    tpu.vector_store %arg24[%c2_134, %c0_135], %128 {strides = array<i32>} : memref<14x56xf32, #tpu.memory_space<vmem>>, vector<2x56xf32>,
    %c0_136 = arith.constant 0 : index
    %c112 = arith.constant 112 : index
    %130 = vector.load %arg23[%c0_136, %c112] : memref<2x392xf32, #tpu.memory_space<vmem>>, vector<2x56xf32>
    %c4_137 = arith.constant 4 : index
    %c0_138 = arith.constant 0 : index
    %131 = vector.load %arg24[%c4_137, %c0_138] : memref<14x56xf32, #tpu.memory_space<vmem>>, vector<2x56xf32>
    tpu.vector_store %arg24[%c4_137, %c0_138], %130 {strides = array<i32>} : memref<14x56xf32, #tpu.memory_space<vmem>>, vector<2x56xf32>,
    %c0_139 = arith.constant 0 : index
    %c168 = arith.constant 168 : index
    %132 = vector.load %arg23[%c0_139, %c168] : memref<2x392xf32, #tpu.memory_space<vmem>>, vector<2x56xf32>
    %c6_140 = arith.constant 6 : index
    %c0_141 = arith.constant 0 : index
    %133 = vector.load %arg24[%c6_140, %c0_141] : memref<14x56xf32, #tpu.memory_space<vmem>>, vector<2x56xf32>
    tpu.vector_store %arg24[%c6_140, %c0_141], %132 {strides = array<i32>} : memref<14x56xf32, #tpu.memory_space<vmem>>, vector<2x56xf32>,
    %c0_142 = arith.constant 0 : index
    %c224 = arith.constant 224 : index
    %134 = vector.load %arg23[%c0_142, %c224] : memref<2x392xf32, #tpu.memory_space<vmem>>, vector<2x56xf32>
    %c8_143 = arith.constant 8 : index
    %c0_144 = arith.constant 0 : index
    %135 = vector.load %arg24[%c8_143, %c0_144] : memref<14x56xf32, #tpu.memory_space<vmem>>, vector<2x56xf32>
    tpu.vector_store %arg24[%c8_143, %c0_144], %134 {strides = array<i32>} : memref<14x56xf32, #tpu.memory_space<vmem>>, vector<2x56xf32>,
    %c0_145 = arith.constant 0 : index
    %c280 = arith.constant 280 : index
    %136 = vector.load %arg23[%c0_145, %c280] : memref<2x392xf32, #tpu.memory_space<vmem>>, vector<2x56xf32>
    %c10_146 = arith.constant 10 : index
    %c0_147 = arith.constant 0 : index
    %137 = vector.load %arg24[%c10_146, %c0_147] : memref<14x56xf32, #tpu.memory_space<vmem>>, vector<2x56xf32>
    tpu.vector_store %arg24[%c10_146, %c0_147], %136 {strides = array<i32>} : memref<14x56xf32, #tpu.memory_space<vmem>>, vector<2x56xf32>,
    %c0_148 = arith.constant 0 : index
    %c336 = arith.constant 336 : index
    %138 = vector.load %arg23[%c0_148, %c336] : memref<2x392xf32, #tpu.memory_space<vmem>>, vector<2x56xf32>
    %c12_149 = arith.constant 12 : index
    %c0_150 = arith.constant 0 : index
    %139 = vector.load %arg24[%c12_149, %c0_150] : memref<14x56xf32, #tpu.memory_space<vmem>>, vector<2x56xf32>
    tpu.vector_store %arg24[%c12_149, %c0_150], %138 {strides = array<i32>} : memref<14x56xf32, #tpu.memory_space<vmem>>, vector<2x56xf32>,
    %c0_151 = arith.constant 0 : index
    %c0_152 = arith.constant 0 : index
    %140 = vector.load %arg24[%c0_151, %c0_152] : memref<14x56xf32, #tpu.memory_space<vmem>>, vector<14x56xf32>
    %c0_153 = arith.constant 0 : index
    %c0_154 = arith.constant 0 : index
    %c0_155 = arith.constant 0 : index
    %141 = vector.load %arg12[%c0_153, %c0_154, %c0_155] : memref<4x28x14xf32, #tpu.memory_space<vmem>>, vector<1x28x14xf32>
    %142 = vector.shape_cast %141 : vector<1x28x14xf32> to vector<28x14xf32>
    %cst_156 = arith.constant dense<0.000000e+00> : vector<28x56xf32>
    %143 = tpu.matmul %142, %140, %cst_156 {dimension_numbers = #tpu.dot_dimension_numbers<[1], [0], [0], [1], [0, 0, 1, 1], [], []>} : vector<28x14xf32>, vector<14x56xf32>, vector<28x56xf32> -> vector<28x56xf32>
    %c0_157 = arith.constant 0 : index
    %c0_158 = arith.constant 0 : index
    %c0_159 = arith.constant 0 : index
    %144 = vector.load %arg13[%c0_157, %c0_158, %c0_159] : memref<4x56x56xf32, #tpu.memory_space<vmem>>, vector<1x56x56xf32>
    %145 = vector.shape_cast %144 : vector<1x56x56xf32> to vector<56x56xf32>
    %cst_160 = arith.constant dense<0.000000e+00> : vector<28x56xf32>
    %146 = tpu.matmul %143, %145, %cst_160 {dimension_numbers = #tpu.dot_dimension_numbers<[1], [0], [0], [1], [0, 0, 1, 1], [], []>} : vector<28x56xf32>, vector<56x56xf32>, vector<28x56xf32> -> vector<28x56xf32>
    %c1_161 = arith.constant 1 : index
    %c0_162 = arith.constant 0 : index
    %c0_163 = arith.constant 0 : index
    %147 = vector.load %arg12[%c1_161, %c0_162, %c0_163] : memref<4x28x14xf32, #tpu.memory_space<vmem>>, vector<1x28x14xf32>
    %148 = vector.shape_cast %147 : vector<1x28x14xf32> to vector<28x14xf32>
    %cst_164 = arith.constant dense<0.000000e+00> : vector<28x56xf32>
    %149 = tpu.matmul %148, %140, %cst_164 {dimension_numbers = #tpu.dot_dimension_numbers<[1], [0], [0], [1], [0, 0, 1, 1], [], []>} : vector<28x14xf32>, vector<14x56xf32>, vector<28x56xf32> -> vector<28x56xf32>
    %c1_165 = arith.constant 1 : index
    %c0_166 = arith.constant 0 : index
    %c0_167 = arith.constant 0 : index
    %150 = vector.load %arg13[%c1_165, %c0_166, %c0_167] : memref<4x56x56xf32, #tpu.memory_space<vmem>>, vector<1x56x56xf32>
    %151 = vector.shape_cast %150 : vector<1x56x56xf32> to vector<56x56xf32>
    %cst_168 = arith.constant dense<0.000000e+00> : vector<28x56xf32>
    %152 = tpu.matmul %149, %151, %cst_168 {dimension_numbers = #tpu.dot_dimension_numbers<[1], [0], [0], [1], [0, 0, 1, 1], [], []>} : vector<28x56xf32>, vector<56x56xf32>, vector<28x56xf32> -> vector<28x56xf32>
    %153 = arith.addf %146, %152 : vector<28x56xf32>
    %c2_169 = arith.constant 2 : index
    %c0_170 = arith.constant 0 : index
    %c0_171 = arith.constant 0 : index
    %154 = vector.load %arg12[%c2_169, %c0_170, %c0_171] : memref<4x28x14xf32, #tpu.memory_space<vmem>>, vector<1x28x14xf32>
    %155 = vector.shape_cast %154 : vector<1x28x14xf32> to vector<28x14xf32>
    %cst_172 = arith.constant dense<0.000000e+00> : vector<28x56xf32>
    %156 = tpu.matmul %155, %140, %cst_172 {dimension_numbers = #tpu.dot_dimension_numbers<[1], [0], [0], [1], [0, 0, 1, 1], [], []>} : vector<28x14xf32>, vector<14x56xf32>, vector<28x56xf32> -> vector<28x56xf32>
    %c2_173 = arith.constant 2 : index
    %c0_174 = arith.constant 0 : index
    %c0_175 = arith.constant 0 : index
    %157 = vector.load %arg13[%c2_173, %c0_174, %c0_175] : memref<4x56x56xf32, #tpu.memory_space<vmem>>, vector<1x56x56xf32>
    %158 = vector.shape_cast %157 : vector<1x56x56xf32> to vector<56x56xf32>
    %cst_176 = arith.constant dense<0.000000e+00> : vector<28x56xf32>
    %159 = tpu.matmul %156, %158, %cst_176 {dimension_numbers = #tpu.dot_dimension_numbers<[1], [0], [0], [1], [0, 0, 1, 1], [], []>} : vector<28x56xf32>, vector<56x56xf32>, vector<28x56xf32> -> vector<28x56xf32>
    %160 = arith.addf %153, %159 : vector<28x56xf32>
    %c3_177 = arith.constant 3 : index
    %c0_178 = arith.constant 0 : index
    %c0_179 = arith.constant 0 : index
    %161 = vector.load %arg12[%c3_177, %c0_178, %c0_179] : memref<4x28x14xf32, #tpu.memory_space<vmem>>, vector<1x28x14xf32>
    %162 = vector.shape_cast %161 : vector<1x28x14xf32> to vector<28x14xf32>
    %cst_180 = arith.constant dense<0.000000e+00> : vector<28x56xf32>
    %163 = tpu.matmul %162, %140, %cst_180 {dimension_numbers = #tpu.dot_dimension_numbers<[1], [0], [0], [1], [0, 0, 1, 1], [], []>} : vector<28x14xf32>, vector<14x56xf32>, vector<28x56xf32> -> vector<28x56xf32>
    %c3_181 = arith.constant 3 : index
    %c0_182 = arith.constant 0 : index
    %c0_183 = arith.constant 0 : index
    %164 = vector.load %arg13[%c3_181, %c0_182, %c0_183] : memref<4x56x56xf32, #tpu.memory_space<vmem>>, vector<1x56x56xf32>
    %165 = vector.shape_cast %164 : vector<1x56x56xf32> to vector<56x56xf32>
    %cst_184 = arith.constant dense<0.000000e+00> : vector<28x56xf32>
    %166 = tpu.matmul %163, %165, %cst_184 {dimension_numbers = #tpu.dot_dimension_numbers<[1], [0], [0], [1], [0, 0, 1, 1], [], []>} : vector<28x56xf32>, vector<56x56xf32>, vector<28x56xf32> -> vector<28x56xf32>
    %167 = arith.addf %160, %166 : vector<28x56xf32>
    %c0_185 = arith.constant 0 : index
    %c0_186 = arith.constant 0 : index
    %168 = vector.load %arg14[%c0_185, %c0_186] : memref<1x56xf32, #tpu.memory_space<vmem>>, vector<1x56xf32>
    %169 = vector.broadcast %168 : vector<1x56xf32> to vector<28x56xf32>
    %170 = arith.addf %167, %169 : vector<28x56xf32>
    %cst_187 = arith.constant 0.000000e+00 : f32
    %171 = vector.broadcast %cst_187 : f32 to vector<28x56xf32>
    %172 = arith.maximumf %170, %171 : vector<28x56xf32>
    %c0_188 = arith.constant 0 : index
    %c0_189 = arith.constant 0 : index
    %c0_190 = arith.constant 0 : index
    %c0_191 = arith.constant 0 : index
    %173 = vector.load %arg15[%c0_188, %c0_189, %c0_190, %c0_191] : memref<2x4x28x28xf32, #tpu.memory_space<vmem>>, vector<1x1x28x28xf32>
    %174 = vector.shape_cast %173 : vector<1x1x28x28xf32> to vector<28x28xf32>
    %cst_192 = arith.constant dense<0.000000e+00> : vector<28x56xf32>
    %175 = tpu.matmul %174, %172, %cst_192 {dimension_numbers = #tpu.dot_dimension_numbers<[1], [0], [0], [1], [0, 0, 1, 1], [], []>} : vector<28x28xf32>, vector<28x56xf32>, vector<28x56xf32> -> vector<28x56xf32>
    %c0_193 = arith.constant 0 : index
    %c0_194 = arith.constant 0 : index
    %c0_195 = arith.constant 0 : index
    %176 = vector.load %arg16[%c0_193, %c0_194, %c0_195] : memref<4x56x28xf32, #tpu.memory_space<vmem>>, vector<1x56x28xf32>
    %177 = vector.shape_cast %176 : vector<1x56x28xf32> to vector<56x28xf32>
    %cst_196 = arith.constant dense<0.000000e+00> : vector<28x28xf32>
    %178 = tpu.matmul %175, %177, %cst_196 {dimension_numbers = #tpu.dot_dimension_numbers<[1], [0], [0], [1], [0, 0, 1, 1], [], []>} : vector<28x56xf32>, vector<56x28xf32>, vector<28x28xf32> -> vector<28x28xf32>
    %c0_197 = arith.constant 0 : index
    %c1_198 = arith.constant 1 : index
    %c0_199 = arith.constant 0 : index
    %c0_200 = arith.constant 0 : index
    %179 = vector.load %arg15[%c0_197, %c1_198, %c0_199, %c0_200] : memref<2x4x28x28xf32, #tpu.memory_space<vmem>>, vector<1x1x28x28xf32>
    %180 = vector.shape_cast %179 : vector<1x1x28x28xf32> to vector<28x28xf32>
    %cst_201 = arith.constant dense<0.000000e+00> : vector<28x56xf32>
    %181 = tpu.matmul %180, %172, %cst_201 {dimension_numbers = #tpu.dot_dimension_numbers<[1], [0], [0], [1], [0, 0, 1, 1], [], []>} : vector<28x28xf32>, vector<28x56xf32>, vector<28x56xf32> -> vector<28x56xf32>
    %c1_202 = arith.constant 1 : index
    %c0_203 = arith.constant 0 : index
    %c0_204 = arith.constant 0 : index
    %182 = vector.load %arg16[%c1_202, %c0_203, %c0_204] : memref<4x56x28xf32, #tpu.memory_space<vmem>>, vector<1x56x28xf32>
    %183 = vector.shape_cast %182 : vector<1x56x28xf32> to vector<56x28xf32>
    %cst_205 = arith.constant dense<0.000000e+00> : vector<28x28xf32>
    %184 = tpu.matmul %181, %183, %cst_205 {dimension_numbers = #tpu.dot_dimension_numbers<[1], [0], [0], [1], [0, 0, 1, 1], [], []>} : vector<28x56xf32>, vector<56x28xf32>, vector<28x28xf32> -> vector<28x28xf32>
    %185 = arith.addf %178, %184 : vector<28x28xf32>
    %c0_206 = arith.constant 0 : index
    %c2_207 = arith.constant 2 : index
    %c0_208 = arith.constant 0 : index
    %c0_209 = arith.constant 0 : index
    %186 = vector.load %arg15[%c0_206, %c2_207, %c0_208, %c0_209] : memref<2x4x28x28xf32, #tpu.memory_space<vmem>>, vector<1x1x28x28xf32>
    %187 = vector.shape_cast %186 : vector<1x1x28x28xf32> to vector<28x28xf32>
    %cst_210 = arith.constant dense<0.000000e+00> : vector<28x56xf32>
    %188 = tpu.matmul %187, %172, %cst_210 {dimension_numbers = #tpu.dot_dimension_numbers<[1], [0], [0], [1], [0, 0, 1, 1], [], []>} : vector<28x28xf32>, vector<28x56xf32>, vector<28x56xf32> -> vector<28x56xf32>
    %c2_211 = arith.constant 2 : index
    %c0_212 = arith.constant 0 : index
    %c0_213 = arith.constant 0 : index
    %189 = vector.load %arg16[%c2_211, %c0_212, %c0_213] : memref<4x56x28xf32, #tpu.memory_space<vmem>>, vector<1x56x28xf32>
    %190 = vector.shape_cast %189 : vector<1x56x28xf32> to vector<56x28xf32>
    %cst_214 = arith.constant dense<0.000000e+00> : vector<28x28xf32>
    %191 = tpu.matmul %188, %190, %cst_214 {dimension_numbers = #tpu.dot_dimension_numbers<[1], [0], [0], [1], [0, 0, 1, 1], [], []>} : vector<28x56xf32>, vector<56x28xf32>, vector<28x28xf32> -> vector<28x28xf32>
    %192 = arith.addf %185, %191 : vector<28x28xf32>
    %c0_215 = arith.constant 0 : index
    %c3_216 = arith.constant 3 : index
    %c0_217 = arith.constant 0 : index
    %c0_218 = arith.constant 0 : index
    %193 = vector.load %arg15[%c0_215, %c3_216, %c0_217, %c0_218] : memref<2x4x28x28xf32, #tpu.memory_space<vmem>>, vector<1x1x28x28xf32>
    %194 = vector.shape_cast %193 : vector<1x1x28x28xf32> to vector<28x28xf32>
    %cst_219 = arith.constant dense<0.000000e+00> : vector<28x56xf32>
    %195 = tpu.matmul %194, %172, %cst_219 {dimension_numbers = #tpu.dot_dimension_numbers<[1], [0], [0], [1], [0, 0, 1, 1], [], []>} : vector<28x28xf32>, vector<28x56xf32>, vector<28x56xf32> -> vector<28x56xf32>
    %c3_220 = arith.constant 3 : index
    %c0_221 = arith.constant 0 : index
    %c0_222 = arith.constant 0 : index
    %196 = vector.load %arg16[%c3_220, %c0_221, %c0_222] : memref<4x56x28xf32, #tpu.memory_space<vmem>>, vector<1x56x28xf32>
    %197 = vector.shape_cast %196 : vector<1x56x28xf32> to vector<56x28xf32>
    %cst_223 = arith.constant dense<0.000000e+00> : vector<28x28xf32>
    %198 = tpu.matmul %195, %197, %cst_223 {dimension_numbers = #tpu.dot_dimension_numbers<[1], [0], [0], [1], [0, 0, 1, 1], [], []>} : vector<28x56xf32>, vector<56x28xf32>, vector<28x28xf32> -> vector<28x28xf32>
    %199 = arith.addf %192, %198 : vector<28x28xf32>
    %c0_224 = arith.constant 0 : index
    %c0_225 = arith.constant 0 : index
    %200 = vector.load %arg17[%c0_224, %c0_225] : memref<1x28xf32, #tpu.memory_space<vmem>>, vector<1x28xf32>
    %201 = vector.broadcast %200 : vector<1x28xf32> to vector<28x28xf32>
    %202 = arith.addf %199, %201 : vector<28x28xf32>
    %cst_226 = arith.constant 5.000000e-01 : f32
    %203 = vector.broadcast %cst_226 : f32 to vector<28x28xf32>
    %204 = arith.mulf %203, %202 : vector<28x28xf32>
    %205 = math.tanh %204 : vector<28x28xf32>
    %cst_227 = arith.constant 1.000000e+00 : f32
    %206 = vector.broadcast %cst_227 : f32 to vector<28x28xf32>
    %207 = arith.addf %205, %206 : vector<28x28xf32>
    %cst_228 = arith.constant 5.000000e-01 : f32
    %208 = vector.broadcast %cst_228 : f32 to vector<28x28xf32>
    %209 = arith.mulf %208, %207 : vector<28x28xf32>
    %c0_229 = arith.constant 0 : index
    %c0_230 = arith.constant 0 : index
    %c0_231 = arith.constant 0 : index
    %c0_232 = arith.constant 0 : index
    %210 = vector.load %arg18[%c0_229, %c0_230, %c0_231, %c0_232] : memref<2x1x28x28xf32, #tpu.memory_space<vmem>>, vector<1x1x28x28xf32>
    %211 = vector.shape_cast %210 : vector<1x1x28x28xf32> to vector<28x28xf32>
    %212 = vector.shape_cast %209 : vector<28x28xf32> to vector<1x1x28x28xf32>
    tpu.vector_store %arg18[%c0_229, %c0_230, %c0_231, %c0_232], %212 {strides = array<i32>} : memref<2x1x28x28xf32, #tpu.memory_space<vmem>>, vector<1x1x28x28xf32>,
    %c1_233 = arith.constant 1 : index
    %c0_234 = arith.constant 0 : index
    %c0_235 = arith.constant 0 : index
    %c0_236 = arith.constant 0 : index
    %213 = vector.load %arg15[%c1_233, %c0_234, %c0_235, %c0_236] : memref<2x4x28x28xf32, #tpu.memory_space<vmem>>, vector<1x1x28x28xf32>
    %214 = vector.shape_cast %213 : vector<1x1x28x28xf32> to vector<28x28xf32>
    %cst_237 = arith.constant dense<0.000000e+00> : vector<28x56xf32>
    %215 = tpu.matmul %214, %172, %cst_237 {dimension_numbers = #tpu.dot_dimension_numbers<[1], [0], [0], [1], [0, 0, 1, 1], [], []>} : vector<28x28xf32>, vector<28x56xf32>, vector<28x56xf32> -> vector<28x56xf32>
    %c0_238 = arith.constant 0 : index
    %c0_239 = arith.constant 0 : index
    %c0_240 = arith.constant 0 : index
    %216 = vector.load %arg16[%c0_238, %c0_239, %c0_240] : memref<4x56x28xf32, #tpu.memory_space<vmem>>, vector<1x56x28xf32>
    %217 = vector.shape_cast %216 : vector<1x56x28xf32> to vector<56x28xf32>
    %cst_241 = arith.constant dense<0.000000e+00> : vector<28x28xf32>
    %218 = tpu.matmul %215, %217, %cst_241 {dimension_numbers = #tpu.dot_dimension_numbers<[1], [0], [0], [1], [0, 0, 1, 1], [], []>} : vector<28x56xf32>, vector<56x28xf32>, vector<28x28xf32> -> vector<28x28xf32>
    %c1_242 = arith.constant 1 : index
    %c1_243 = arith.constant 1 : index
    %c0_244 = arith.constant 0 : index
    %c0_245 = arith.constant 0 : index
    %219 = vector.load %arg15[%c1_242, %c1_243, %c0_244, %c0_245] : memref<2x4x28x28xf32, #tpu.memory_space<vmem>>, vector<1x1x28x28xf32>
    %220 = vector.shape_cast %219 : vector<1x1x28x28xf32> to vector<28x28xf32>
    %cst_246 = arith.constant dense<0.000000e+00> : vector<28x56xf32>
    %221 = tpu.matmul %220, %172, %cst_246 {dimension_numbers = #tpu.dot_dimension_numbers<[1], [0], [0], [1], [0, 0, 1, 1], [], []>} : vector<28x28xf32>, vector<28x56xf32>, vector<28x56xf32> -> vector<28x56xf32>
    %c1_247 = arith.constant 1 : index
    %c0_248 = arith.constant 0 : index
    %c0_249 = arith.constant 0 : index
    %222 = vector.load %arg16[%c1_247, %c0_248, %c0_249] : memref<4x56x28xf32, #tpu.memory_space<vmem>>, vector<1x56x28xf32>
    %223 = vector.shape_cast %222 : vector<1x56x28xf32> to vector<56x28xf32>
    %cst_250 = arith.constant dense<0.000000e+00> : vector<28x28xf32>
    %224 = tpu.matmul %221, %223, %cst_250 {dimension_numbers = #tpu.dot_dimension_numbers<[1], [0], [0], [1], [0, 0, 1, 1], [], []>} : vector<28x56xf32>, vector<56x28xf32>, vector<28x28xf32> -> vector<28x28xf32>
    %225 = arith.addf %218, %224 : vector<28x28xf32>
    %c1_251 = arith.constant 1 : index
    %c2_252 = arith.constant 2 : index
    %c0_253 = arith.constant 0 : index
    %c0_254 = arith.constant 0 : index
    %226 = vector.load %arg15[%c1_251, %c2_252, %c0_253, %c0_254] : memref<2x4x28x28xf32, #tpu.memory_space<vmem>>, vector<1x1x28x28xf32>
    %227 = vector.shape_cast %226 : vector<1x1x28x28xf32> to vector<28x28xf32>
    %cst_255 = arith.constant dense<0.000000e+00> : vector<28x56xf32>
    %228 = tpu.matmul %227, %172, %cst_255 {dimension_numbers = #tpu.dot_dimension_numbers<[1], [0], [0], [1], [0, 0, 1, 1], [], []>} : vector<28x28xf32>, vector<28x56xf32>, vector<28x56xf32> -> vector<28x56xf32>
    %c2_256 = arith.constant 2 : index
    %c0_257 = arith.constant 0 : index
    %c0_258 = arith.constant 0 : index
    %229 = vector.load %arg16[%c2_256, %c0_257, %c0_258] : memref<4x56x28xf32, #tpu.memory_space<vmem>>, vector<1x56x28xf32>
    %230 = vector.shape_cast %229 : vector<1x56x28xf32> to vector<56x28xf32>
    %cst_259 = arith.constant dense<0.000000e+00> : vector<28x28xf32>
    %231 = tpu.matmul %228, %230, %cst_259 {dimension_numbers = #tpu.dot_dimension_numbers<[1], [0], [0], [1], [0, 0, 1, 1], [], []>} : vector<28x56xf32>, vector<56x28xf32>, vector<28x28xf32> -> vector<28x28xf32>
    %232 = arith.addf %225, %231 : vector<28x28xf32>
    %c1_260 = arith.constant 1 : index
    %c3_261 = arith.constant 3 : index
    %c0_262 = arith.constant 0 : index
    %c0_263 = arith.constant 0 : index
    %233 = vector.load %arg15[%c1_260, %c3_261, %c0_262, %c0_263] : memref<2x4x28x28xf32, #tpu.memory_space<vmem>>, vector<1x1x28x28xf32>
    %234 = vector.shape_cast %233 : vector<1x1x28x28xf32> to vector<28x28xf32>
    %cst_264 = arith.constant dense<0.000000e+00> : vector<28x56xf32>
    %235 = tpu.matmul %234, %172, %cst_264 {dimension_numbers = #tpu.dot_dimension_numbers<[1], [0], [0], [1], [0, 0, 1, 1], [], []>} : vector<28x28xf32>, vector<28x56xf32>, vector<28x56xf32> -> vector<28x56xf32>
    %c3_265 = arith.constant 3 : index
    %c0_266 = arith.constant 0 : index
    %c0_267 = arith.constant 0 : index
    %236 = vector.load %arg16[%c3_265, %c0_266, %c0_267] : memref<4x56x28xf32, #tpu.memory_space<vmem>>, vector<1x56x28xf32>
    %237 = vector.shape_cast %236 : vector<1x56x28xf32> to vector<56x28xf32>
    %cst_268 = arith.constant dense<0.000000e+00> : vector<28x28xf32>
    %238 = tpu.matmul %235, %237, %cst_268 {dimension_numbers = #tpu.dot_dimension_numbers<[1], [0], [0], [1], [0, 0, 1, 1], [], []>} : vector<28x56xf32>, vector<56x28xf32>, vector<28x28xf32> -> vector<28x28xf32>
    %239 = arith.addf %232, %238 : vector<28x28xf32>
    %c0_269 = arith.constant 0 : index
    %c0_270 = arith.constant 0 : index
    %240 = vector.load %arg17[%c0_269, %c0_270] : memref<1x28xf32, #tpu.memory_space<vmem>>, vector<1x28xf32>
    %241 = vector.broadcast %240 : vector<1x28xf32> to vector<28x28xf32>
    %242 = arith.addf %239, %241 : vector<28x28xf32>
    %cst_271 = arith.constant 5.000000e-01 : f32
    %243 = vector.broadcast %cst_271 : f32 to vector<28x28xf32>
    %244 = arith.mulf %243, %242 : vector<28x28xf32>
    %245 = math.tanh %244 : vector<28x28xf32>
    %cst_272 = arith.constant 1.000000e+00 : f32
    %246 = vector.broadcast %cst_272 : f32 to vector<28x28xf32>
    %247 = arith.addf %245, %246 : vector<28x28xf32>
    %cst_273 = arith.constant 5.000000e-01 : f32
    %248 = vector.broadcast %cst_273 : f32 to vector<28x28xf32>
    %249 = arith.mulf %248, %247 : vector<28x28xf32>
    %c1_274 = arith.constant 1 : index
    %c0_275 = arith.constant 0 : index
    %c0_276 = arith.constant 0 : index
    %c0_277 = arith.constant 0 : index
    %250 = vector.load %arg18[%c1_274, %c0_275, %c0_276, %c0_277] : memref<2x1x28x28xf32, #tpu.memory_space<vmem>>, vector<1x1x28x28xf32>
    %251 = vector.shape_cast %250 : vector<1x1x28x28xf32> to vector<28x28xf32>
    %252 = vector.shape_cast %249 : vector<28x28xf32> to vector<1x1x28x28xf32>
    tpu.vector_store %arg18[%c1_274, %c0_275, %c0_276, %c0_277], %252 {strides = array<i32>} : memref<2x1x28x28xf32, #tpu.memory_space<vmem>>, vector<1x1x28x28xf32>,
    return
  }
}

</mosaic_0001>

<bundles_post_ra>
// kernel: vae_forward.1
= control target key start
LH: loop header
LB: loop body
LE: loop exit
PB: predicated region body
PF: predicated region fallthrough
CT: control target
= control target key end

     0   :  { %s8753_s0 = inlined_call_operand.vmem [shape: f32[56,28], index: 0, kind: input, shape index: {}]   ;;  %s8754_s1 = inlined_call_operand.vmem [shape: f32[2,16], index: 1, kind: input, shape index: {}]   ;;  %s8755_s2 = inlined_call_operand.vmem [shape: f32[4,28,56], index: 2, kind: input, shape index: {}]   ;;  %s8756_s3 = inlined_call_operand.vmem [shape: f32[4,28,56], index: 3, kind: input, shape index: {}]   ;;  %s8757_s4 = inlined_call_operand.vmem [shape: f32[1,56], index: 4, kind: input, shape index: {}]   ;;  %s8758_s5 = inlined_call_operand.vmem [shape: f32[4,14,28], index: 5, kind: input, shape index: {}]   ;;  %s8759_s6 = inlined_call_operand.vmem [shape: f32[4,56,56], index: 6, kind: input, shape index: {}]   ;;  %s8760_s7 = inlined_call_operand.vmem [shape: f32[1,56], index: 7, kind: input, shape index: {}]   ;;  %s8761_s8 = inlined_call_operand.vmem [shape: f32[7,56,32], index: 8, kind: input, shape index: {}]   ;;  %s8762_s9 = inlined_call_operand.vmem [shape: f32[1,32], index: 9, kind: input, shape index: {}]   ;;  %s8763_s10 = inlined_call_operand.vmem [shape: f32[16,392], index: 10, kind: input, shape index: {}]   ;;  %s8764_s11 = inlined_call_operand.vmem [shape: f32[1,392], index: 11, kind: input, shape index: {}]   ;;  %s8765_s12 = inlined_call_operand.vmem [shape: f32[4,28,14], index: 12, kind: input, shape index: {}]   ;;  %s8766_s13 = inlined_call_operand.vmem [shape: f32[4,56,56], index: 13, kind: input, shape index: {}]   ;;  %s8767_s14 = inlined_call_operand.vmem [shape: f32[1,56], index: 14, kind: input, shape index: {}]   ;;  %s8768_s15 = inlined_call_operand.vmem [shape: f32[2,4,28,28], index: 15, kind: input, shape index: {}]   ;;  %s8769_s16 = inlined_call_operand.vmem [shape: f32[4,56,28], index: 16, kind: input, shape index: {}]   ;;  %s8770_s17 = inlined_call_operand.vmem [shape: f32[1,28], index: 17, kind: input, shape index: {}]   ;;  %s8771_s18 = inlined_call_operand.vmem [shape: f32[2,1,28,28], index: 18, kind: output, shape index: {0}]   ;;  %s8772_s19 = inlined_call_operand.hbm [shape: f32[2,16], index: 19, kind: output, shape index: {1}]   ;;  %s8773_s20 = inlined_call_operand.hbm [shape: f32[2,16], index: 20, kind: output, shape index: {2}]  }
   0x1   :  { %8777 = sst [smem:[#allocation12_spill]] %s8753_s0 }
   0x2   :  { %8778 = sst [smem:[#allocation13_spill]] %s8754_s1 }
   0x3   :  { %8779 = sst [smem:[#allocation14_spill]] %s8755_s2 }
   0x4   :  { %8780 = sst [smem:[#allocation15_spill]] %s8756_s3 }
   0x5   :  { %8781 = sst [smem:[#allocation16_spill]] %s8757_s4 }
   0x6   :  { %26 = vsyncpa [#allocation7], 0  ;;  %s8782_s23 = sld [smem:[#allocation12_spill]]  ;;  %vm75_vm0 = vcmask 457728   ;;  %s8783_s1 = sld [smem:[#allocation14_spill]]  ;;  %vm297_vm1 = vcmask 1043456  }
   0x7   :  { %s8784_s2 = sld [smem:[#allocation15_spill]]  ;;  %vm7358_vm2 = vmmov 1  }
   0x8   :  { %vm7521_vm3 = vmpackc.low %vm297_vm1, %vm7358_vm2 }
   0xc   :  { %v64_v0 = vld [vmem:[%s8782_s23] sm:$0xff]  ;;  %v65_v1 = vld [vmem:[%s8782_s23 + $0x8] sm:$0xff]  ;;  %v66_v2 = vld [vmem:[%s8782_s23 + $0x10] sm:$0xff] }
   0xd   :  { %v7486_v3 = vpack.c.bf16 %v65_v1, %v64_v0  ;;  %v67_v4 = vld [vmem:[%s8782_s23 + $0x18] sm:$0xff]  ;;  %v68_v6 = vld [vmem:[%s8782_s23 + $0x20] sm:$0xff]  ;;  %v69_v7 = vld [vmem:[%s8782_s23 + $0x28] sm:$0xff] }
   0xe   :  { %v7491_v5 = vpack.c.bf16 %v67_v4, %v66_v2  ;;  %v71_v8 = vld [vmem:[%s8783_s1] sm:$0xff]  ;;  %v7506_v9 = vpack.c.bf16 %v69_v7, %v68_v6  ;;  %v174_v11 = vld [vmem:[%s8784_s2 + $0x8] sm:$0xff]  ;;  %v175_v12 = vld [vmem:[%s8784_s2 + $0x10] sm:$0xff] }
   0xf   :  { %6730 = vmatprep.subr.bf16.mxu1 %v7486_v3  ;;  %5984 = vmatprep.mubr.msk.f32.mxu1 %vm75_vm0, %v71_v8  ;;  %v173_v10 = vld [vmem:[%s8784_s2] sm:$0xff]  ;;  %v176_v14 = vld [vmem:[%s8784_s2 + $0x18] sm:$0xf] }
  0x10   :  { %6732 = vmatpush3.bf16.msra.mxu1 %v7486_v3  ;;  %v6763_v13 = vpack.c.bf16 %v174_v11, %v173_v10  ;;  %v6767_v16 = vpack.c.bf16 %v176_v14, %v175_v12 }
  0x11   :  { %6734 = vmatprep.subr.bf16.mxu1 %v7491_v5 }
  0x12   :  { %27 = vsyncpa [#allocation9], 0  ;;  %6764 = vmatprep.subr.bf16.mxu0 %v6763_v13  ;;  %v7530_v17 = vld [vmem:[%s8782_s23 + $0x30] sm:$0xff]  ;;  %v72_v18 = vld [vmem:[%s8783_s1 + $0x8] sm:$0xff]  ;;  %vm284_vm4 = vcmask 228352   ;;  %s8787_s3 = sld [smem:[#allocation16_spill]] }
  0x13   :  { %6766 = vmatpush3.bf16.msra.mxu0 %v6763_v13  ;;  %v73_v19 = vld [vmem:[%s8783_s1 + $0x10] sm:$0xff]  ;;  %v74_v20 = vld [vmem:[%s8783_s1 + $0x18] sm:$0xf]  ;;  %v5176_v21 = vld [vmem:[%s8783_s1 + $0x20] sm:$0xff]  ;;  %vm7360_vm5 = vmmov 0   ;;  %s8788_s26 = sld [smem:[#allocation13_spill]] }
  0x14   :  { %6736 = vmatpush3.bf16.msra.mxu1 %v7491_v5  ;;  %6769 = vmatprep.subr.msk.bf16.mxu0 %vm7521_vm3, %v6767_v16  ;;  %v5177_v22 = vld [vmem:[%s8783_s1 + $0x28] sm:$0xff]  ;;  %v5178_v23 = vld [vmem:[%s8783_s1 + $0x30] sm:$0xff]  ;;  %v5179_v24 = vld [vmem:[%s8783_s1 + $0x38] sm:$0xf]  ;;  %s7362_s27 = smov 16   ;;  %vm1632_vm6 = vcmask 455680  }
  0x15   :  { %6738 = vmatprep.subr.bf16.mxu1 %v7506_v9  ;;  %v5184_v25 = vld [vmem:[%s8784_s2 + $0x20] sm:$0xff]  ;;  %v5185_v26 = vld [vmem:[%s8784_s2 + $0x28] sm:$0xff]  ;;  %v5186_v28 = vld [vmem:[%s8784_s2 + $0x30] sm:$0xff]  ;;  %vm2220_vm7 = vcmask 254976   ;;  %vm2239_vm8 = vcmask 123904   ;;  %vm2276_vm9 = vcmask 130048  }
  0x16   :  { %v6753_v27 = vpack.c.bf16 %v5185_v26, %v5184_v25  ;;  %v5187_v29 = vld [vmem:[%s8784_s2 + $0x38] sm:$0xf]  ;;  %v5198_v39 = vld [vmem:[%s8783_s1 + $0x40] sm:$0xff]  ;;  %v5199_v40 = vld [vmem:[%s8783_s1 + $0x48] sm:$0xff]  ;;  %vm2448_vm10 = vcmask 1041408   ;;  %vm2449_vm11 = vcmask 1043458  }
  0x17   :  { %6772 = vmatpush3.bf16.msk.msra.mxu0 %vm7521_vm3, %v6767_v16  ;;  %v6757_v30 = vpack.c.bf16 %v5187_v29, %v5186_v28  ;;  %v5200_v41 = vld [vmem:[%s8783_s1 + $0x50] sm:$0xff]  ;;  %v5201_v42 = vld [vmem:[%s8783_s1 + $0x58] sm:$0xf]  ;;  %v5215_v43 = vld [vmem:[%s8783_s1 + $0x60] sm:$0xff]  ;;  %vm2451_vm13 = vcmask 1045508   ;;  %vm2453_vm15 = vcmask 64518  }
  0x18   :  { %6740 = vmatpush3.bf16.msra.mxu1 %v7506_v9  ;;  %v5216_v44 = vld [vmem:[%s8783_s1 + $0x68] sm:$0xff]  ;;  %v5217_v45 = vld [vmem:[%s8783_s1 + $0x70] sm:$0xff]  ;;  %v5218_v46 = vld [vmem:[%s8783_s1 + $0x78] sm:$0xf]  ;;  %s7367_s21 = smov 72  }
  0x19   :  { %5982 = vmatprep.subr.mxu1 %v7530_v17  ;;  %v5206_v47 = vld [vmem:[%s8784_s2 + $0x40] sm:$0xff]  ;;  %v5207_v48 = vld [vmem:[%s8784_s2 + $0x48] sm:$0xff]  ;;  %v5208_v49 = vld [vmem:[%s8784_s2 + $0x50] sm:$0xff] }
  0x1a   :  { %v6785_v50 = vpack.c.bf16 %v5207_v48, %v5206_v47  ;;  %v5209_v51 = vld [vmem:[%s8784_s2 + $0x58] sm:$0xf]  ;;  %v5223_v53 = vld [vmem:[%s8784_s2 + $0x60] sm:$0xff]  ;;  %v5224_v54 = vld [vmem:[%s8784_s2 + $0x68] sm:$0xff]  ;;  %v7359_v48 = vmov 0.0|0.0  }
  0x1b   :  { %v6789_v52 = vpack.c.bf16 %v5209_v51, %v5208_v49  ;;  %v6807_v55 = vpack.c.bf16 %v5224_v54, %v5223_v53  ;;  %v5225_v60 = vld [vmem:[%s8784_s2 + $0x70] sm:$0xff]  ;;  %v5226_v61 = vld [vmem:[%s8784_s2 + $0x78] sm:$0xf]  ;;  %v923_v8 = vld [vmem:[%s8758_s5] sm:$0xff]  ;;  %s7366_s2 = smov 48  }
  0x1c   :  { %5983 = vmatpush3.msra.mxu1 %v7530_v17  ;;  %6786 = vmatprep.subr.bf16.mxu0 %v6785_v50  ;;  %v6811_v0 = vpack.c.bf16 %v5226_v61, %v5225_v60  ;;  %v5236_v7 = vld [vmem:[%s8758_s5 + $0x10] sm:$0xff]  ;;  %v5232_v10 = vld [vmem:[%s8787_s3] ss:$0 sm:$0xff]  ;;  %vm2450_vm12 = vmor %vm2449_vm11, %vm2448_vm10  ;;  %vm2547_vm10 = vcmask 392192  }
  0x1d   :  { %5985 = vmatmul.mubr.msk.f32.vlgmr.msra.gmra.mrb[0].mxu1 %vm75_vm0, %v72_v18  ;;  %6742 = vmatprep.subr.bf16.mxu1 %v7486_v3  ;;  %v5242_v28 = vld [vmem:[%s8759_s6 + $0x40] sm:$0xff]  ;;  %v1011_v49 = vld [vmem:[%s8759_s6 + $0x10] sm:$0xff]  ;;  %vm2452_vm14 = vmor %vm2451_vm13, %vm2450_vm12 }
  0x1e   :  { %6744 = vmatpush3.bf16.msra.mxu1 %v7486_v3  ;;  %5987 = vmatprep.mubr.msk.f32.mxu1 %vm75_vm0, %v73_v19  ;;  %v1015_v61 = vld [vmem:[%s8759_s6 + $0x30] sm:$0xff]  ;;  %vm2454_vm1 = vmor %vm2453_vm15, %vm2452_vm14 }
  0x1f   :  { %6746 = vmatprep.subr.bf16.mxu1 %v7491_v5 }
  0x21   :  { %5988 = vmatmul.mubr.msk.f32.gmra.mrb[2].mxu1 %vm75_vm0, %v74_v20 }
  0x22   :  { %6748 = vmatpush3.bf16.msra.mxu1 %v7491_v5  ;;  %6004 = vmatprep.mubr.msk.f32.mxu1 %vm75_vm0, %v5176_v21 }
  0x23   :  { %6750 = vmatprep.subr.bf16.mxu1 %v7506_v9 }
  0x26   :  { %6752 = vmatpush3.bf16.msra.mxu1 %v7506_v9 }
  0x27   :  { %6002 = vmatprep.subr.mxu1 %v7530_v17 }
  0x2a   :  { %6003 = vmatpush3.msra.mxu1 %v7530_v17 }
  0x2b   :  { %6005 = vmatmul.mubr.msk.f32.vlgmr.msra.gmra.mrb[4].mxu1 %vm75_vm0, %v5177_v22  ;;  %6754 = vmatprep.subr.bf16.mxu1 %v6753_v27 }
  0x2c   :  { %6007 = vmatprep.mubr.msk.f32.mxu1 %vm75_vm0, %v5178_v23  ;;  %6756 = vmatpush3.bf16.msra.mxu1 %v6753_v27  ;;  %v5241_v27 = vld [vmem:[%s8759_s6 + $0x38] sm:$0xff] }
  0x2d   :  { %6759 = vmatprep.subr.msk.bf16.mxu1 %vm7521_vm3, %v6757_v30 }
  0x2f   :  { %6008 = vmatmul.mubr.msk.f32.gmra.mrb[6].mxu1 %vm75_vm0, %v5179_v24 }
  0x30   :  { %6762 = vmatpush3.bf16.msk.msra.mxu1 %vm7521_vm3, %v6757_v30 }
  0x31   :  { %6774 = vmatprep.subr.bf16.mxu1 %v7486_v3 }
  0xf0   :  { %v5986_v31 = vpop.f32.mrb[0].mxu1 }
  0xf1   :  { %v154_v32 = vpop.f32.mrb[1].mxu1 }
  0xf2   :  { %6032 = vmatprep.mubr.msk.f32.mxu0 %vm284_vm4, %v154_v32  ;;  %v5243_v32 = vld [vmem:[%s8759_s6 + $0x48] sm:$0xff] }
  0xf3   :  { %6033 = vmatmul.mubr.msk.f32.vlgmr.msra.gmra.mrb[0].mxu0 %vm284_vm4, %v5986_v31  ;;  %v6837_v31 = vpack.c.bf16 %v5242_v28, %v5241_v27  ;;  %v5283_v27 = vld [vmem:[%s8761_s8 + $0x48] sm:$0xff]  ;;  %v5284_v28 = vld [vmem:[%s8761_s8 + $0x50] sm:$0xff] }
  0xf4   :  { %v5989_v33 = vpop.f32.mrb[2].mxu1  ;;  %6788 = vmatpush3.bf16.msra.mxu0 %v6785_v50  ;;  %v1012_v50 = vld [vmem:[%s8759_s6 + $0x18] sm:$0xff] }
  0xf5   :  { %v164_v34 = vpop.f32.mrb[3].mxu1  ;;  %6791 = vmatprep.subr.msk.bf16.mxu0 %vm7521_vm3, %v6789_v52  ;;  %v6853_v54 = vpack.c.bf16 %v1012_v50, %v1011_v49 }
  0xf6   :  { %6035 = vmatprep.mubr.msk.f32.mxu0 %vm284_vm4, %v164_v34  ;;  %v5237_v34 = vld [vmem:[%s8758_s5 + $0x18] sm:$0x3f] }
  0xf7   :  { %6036 = vmatmul.mubr.msk.f32.gmra.mrb[2].mxu0 %vm284_vm4, %v5989_v33  ;;  %v5244_v33 = vld [vmem:[%s8759_s6 + $0x50] sm:$0xff] }
  0xf8   :  { %6794 = vmatpush3.bf16.msk.msra.mxu0 %vm7521_vm3, %v6789_v52 }
  0xf9   :  { %6808 = vmatprep.subr.bf16.mxu0 %v6807_v55 }
  0xfe   :  { %v6006_v35 = vpop.f32.mrb[4].mxu1 }
  0xff   :  { %v260_v36 = vpop.f32.mrb[5].mxu1 }
 0x100   :  { %6018 = vmatprep.mubr.msk.f32.mxu1 %vm284_vm4, %v260_v36  ;;  %v5252_v36 = vld [vmem:[%s8758_s5 + $0x20] sm:$0xff] }
 0x101   :  { %6019 = vmatmul.mubr.msk.f32.vlgmr.msra.gmra.mrb[8].mxu1 %vm284_vm4, %v6006_v35  ;;  %v924_v35 = vld [vmem:[%s8758_s5 + $0x8] sm:$0x3f] }
 0x102   :  { %6776 = vmatpush3.bf16.msra.mxu1 %v7486_v3  ;;  %v6009_v37 = vpop.f32.mrb[6].mxu1 }
 0x103   :  { %6778 = vmatprep.subr.bf16.mxu1 %v7491_v5  ;;  %v270_v38 = vpop.f32.mrb[7].mxu1 }
 0x104   :  { %6021 = vmatprep.mubr.msk.f32.mxu1 %vm284_vm4, %v270_v38  ;;  %v5245_v38 = vld [vmem:[%s8759_s6 + $0x58] sm:$0xff] }
 0x105   :  { %6022 = vmatmul.mubr.msk.f32.gmra.mrb[10].mxu1 %vm284_vm4, %v6009_v37  ;;  %v6841_v37 = vpack.c.bf16 %v5244_v33, %v5243_v32  ;;  %v5285_v33 = vld [vmem:[%s8761_s8 + $0x58] sm:$0xff] }
 0x106   :  { %6780 = vmatpush3.bf16.msra.mxu1 %v7491_v5  ;;  %6052 = vmatprep.mubr.msk.f32.mxu1 %vm75_vm0, %v5198_v39  ;;  %v5246_v39 = vld [vmem:[%s8759_s6 + $0x60] sm:$0xff] }
 0x107   :  { %6782 = vmatprep.subr.bf16.mxu1 %v7506_v9 }
 0x10a   :  { %6784 = vmatpush3.bf16.msra.mxu1 %v7506_v9 }
 0x10b   :  { %6050 = vmatprep.subr.mxu1 %v7530_v17 }
 0x10e   :  { %6051 = vmatpush3.msra.mxu1 %v7530_v17 }
 0x10f   :  { %6053 = vmatmul.mubr.msk.f32.vlgmr.msra.gmra.mrb[12].mxu1 %vm75_vm0, %v5199_v40  ;;  %6796 = vmatprep.subr.bf16.mxu1 %v7486_v3  ;;  %v6845_v40 = vpack.c.bf16 %v5246_v39, %v5245_v38  ;;  %v7361_v39 = vmov 0.0  }
 0x110   :  { %6798 = vmatpush3.bf16.msra.mxu1 %v7486_v3  ;;  %6055 = vmatprep.mubr.msk.f32.mxu1 %vm75_vm0, %v5200_v41  ;;  %v5253_v41 = vld [vmem:[%s8758_s5 + $0x28] sm:$0x3f] }
 0x111   :  { %6800 = vmatprep.subr.bf16.mxu1 %v7491_v5 }
 0x113   :  { %6056 = vmatmul.mubr.msk.f32.gmra.mrb[14].mxu1 %vm75_vm0, %v5201_v42  ;;  %v5266_v42 = vld [vmem:[%s8758_s5 + $0x30] sm:$0xff] }
 0x114   :  { %6802 = vmatpush3.bf16.msra.mxu1 %v7491_v5  ;;  %6086 = vmatprep.mubr.msk.f32.mxu1 %vm75_vm0, %v5215_v43  ;;  %v5267_v43 = vld [vmem:[%s8758_s5 + $0x38] sm:$0x3f] }
 0x115   :  { %6804 = vmatprep.subr.bf16.mxu1 %v7506_v9 }
 0x118   :  { %6806 = vmatpush3.bf16.msra.mxu1 %v7506_v9 }
 0x119   :  { %6084 = vmatprep.subr.mxu1 %v7530_v17 }
 0x11c   :  { %6085 = vmatpush3.msra.mxu1 %v7530_v17 }
 0x11d   :  { %6087 = vmatmul.mubr.msk.f32.vlgmr.msra.gmra.mrb[16].mxu1 %vm75_vm0, %v5216_v44  ;;  %v5247_v44 = vld [vmem:[%s8759_s6 + $0x68] sm:$0xff] }
 0x11e   :  { %6089 = vmatprep.mubr.msk.f32.mxu1 %vm75_vm0, %v5217_v45  ;;  %v1009_v45 = vld [vmem:[%s8759_s6] sm:$0xff] }
 0x121   :  { %6090 = vmatmul.mubr.msk.f32.gmra.mrb[18].mxu1 %vm75_vm0, %v5218_v46  ;;  %v1010_v46 = vld [vmem:[%s8759_s6 + $0x8] sm:$0xff] }
 0x122   :  { %6114 = vmatprep.mubr.msk.f32.mxu1 %vm284_vm4, %v923_v8  ;;  %v6849_v47 = vpack.c.bf16 %v1010_v46, %v1009_v45 }
 0x1d4   :  { %v6020_v56 = vpop.f32.mrb[8].mxu1 }
 0x1d5   :  { %v367_v57 = vpop.f32.mrb[9].mxu1 }
 0x1d8   :  { %v6023_v58 = vpop.f32.mrb[10].mxu1 }
 0x1d9   :  { %v377_v59 = vpop.f32.mrb[11].mxu1 }
 0x1e2   :  { %v6054_v62 = vpop.f32.mrb[12].mxu1 }
 0x1e3   :  { %v569_v63 = vpop.f32.mrb[13].mxu1 }
 0x1e4   :  { %6066 = vmatprep.mubr.msk.f32.mxu0 %vm284_vm4, %v569_v63  ;;  %v5258_v63 = vld [vmem:[%s8759_s6 + $0x78] sm:$0xff] }
 0x1e5   :  { %6067 = vmatmul.mubr.msk.f32.vlgmr.msra.gmra.mrb[0].mxu0 %vm284_vm4, %v6054_v62  ;;  %v5257_v62 = vld [vmem:[%s8759_s6 + $0x70] sm:$0xff] }
 0x1e6   :  { %v6057_v1 = vpop.f32.mrb[14].mxu1  ;;  %6810 = vmatpush3.bf16.msra.mxu0 %v6807_v55 }
 0x1e7   :  { %v579_v2 = vpop.f32.mrb[15].mxu1  ;;  %6813 = vmatprep.subr.msk.bf16.mxu0 %vm7521_vm3, %v6811_v0 }
 0x1e8   :  { %6069 = vmatprep.mubr.msk.f32.mxu0 %vm284_vm4, %v579_v2  ;;  %v6871_v2 = vpack.c.bf16 %v5258_v63, %v5257_v62 }
 0x1e9   :  { %6070 = vmatmul.mubr.msk.f32.gmra.mrb[2].mxu0 %vm284_vm4, %v6057_v1  ;;  %v5260_v1 = vld [vmem:[%s8759_s6 + $0x88] sm:$0xff] }
 0x1ea   :  { %6816 = vmatpush3.bf16.msk.msra.mxu0 %vm7521_vm3, %v6811_v0  ;;  %v5259_v0 = vld [vmem:[%s8759_s6 + $0x80] sm:$0xff] }
 0x1f0   :  { %v6088_v3 = vpop.f32.mrb[16].mxu1 }
 0x1f1   :  { %v780_v4 = vpop.f32.mrb[17].mxu1 }
 0x1f2   :  { %6100 = vmatprep.mubr.msk.f32.mxu0 %vm284_vm4, %v780_v4  ;;  %v5261_v4 = vld [vmem:[%s8759_s6 + $0x90] sm:$0xff] }
 0x1f3   :  { %6101 = vmatmul.mubr.msk.f32.vlgmr.msra.gmra.mrb[0].mxu0 %vm284_vm4, %v6088_v3  ;;  %v6875_v3 = vpack.c.bf16 %v5260_v1, %v5259_v0  ;;  %v1639_v1 = vld [vmem:[%s8761_s8 + $0x20] sm:$0xff] }
 0x1f4   :  { %v6091_v5 = vpop.f32.mrb[18].mxu1 }
 0x1f5   :  { %v790_v6 = vpop.f32.mrb[19].mxu1 }
 0x1f6   :  { %6103 = vmatprep.mubr.msk.f32.mxu0 %vm284_vm4, %v790_v6 }
 0x1f7   :  { %6104 = vmatmul.mubr.msk.f32.gmra.mrb[2].mxu0 %vm284_vm4, %v6091_v5  ;;  %v5262_v5 = vld [vmem:[%s8759_s6 + $0x98] sm:$0xff] }
 0x1f8   :  { %6125 = vmatprep.mubr.msk.f32.mxu0 %vm284_vm4, %v5236_v7  ;;  %v6879_v8 = vpack.c.bf16 %v5262_v5, %v5261_v4  ;;  %v5319_v4 = vld [vmem:[%s8761_s8 + $0x140] sm:$0xff] }
 0x2c6   :  { %v6102_v9 = vpop.f32.mrb[0].mxu0 }
 0x2c7   :  { %v7224_v11 = vadd.f32 %v6102_v9, %v6020_v56  ;;  %v885_v12 = vpop.f32.mrb[1].mxu0  ;;  %v1013_v56 = vld [vmem:[%s8759_s6 + $0x20] sm:$0xff] }
 0x2c8   :  { %v7225_v13 = vadd.f32 %v885_v12, %v367_v57  ;;  %v1014_v57 = vld [vmem:[%s8759_s6 + $0x28] sm:$0xff]  ;;  %v5263_v9 = vld [vmem:[%s8759_s6 + $0xa0] sm:$0xff]  ;;  %v5273_v12 = vld [vmem:[%s8759_s6 + $0xb8] sm:$0xff] }
 0x2c9   :  { %v916_v14 = vadd.f32 %v7224_v11, %v5232_v10  ;;  %v5272_v11 = vld [vmem:[%s8759_s6 + $0xb0] sm:$0xff] }
 0x2ca   :  { %v915_v16 = vadd.f32 %v7225_v13, %v5232_v10  ;;  %v6105_v17 = vpop.f32.mrb[2].mxu0  ;;  %v5274_v13 = vld [vmem:[%s8759_s6 + $0xc0] sm:$0xff] }
 0x2cb   :  { %v920_v18 = vmax.f32 %v916_v14, 0.0  ;;  %v7226_v19 = vadd.f32 %v6105_v17, %v6023_v58  ;;  %v895_v20 = vpop.f32.mrb[3].mxu0  ;;  %v6857_v58 = vpack.c.bf16 %v1014_v57, %v1013_v56  ;;  %v5275_v17 = vld [vmem:[%s8759_s6 + $0xc8] sm:$0xff]  ;;  %v1637_v57 = vld [vmem:[%s8761_s8 + $0x10] sm:$0xff] }
 0x2cc   :  { %v919_v21 = vmax.f32 %v915_v16, 0.0  ;;  %v7227_v22 = vadd.f32 %v895_v20, %v377_v59  ;;  %v6897_v16 = vpack.c.bf16 %v5274_v13, %v5273_v12  ;;  %v5277_v20 = vld [vmem:[%s8759_s6 + $0xd8] sm:$0xff]  ;;  %v5292_v12 = vld [vmem:[%s8761_s8 + $0x80] sm:$0xff]  ;;  %v5293_v13 = vld [vmem:[%s8761_s8 + $0x88] sm:$0xff] }
 0x2cd   :  { %v918_v23 = vadd.f32 %v7226_v19, %v5232_v10 }
 0x2ce   :  { %v6817_v24 = vpack.c.bf16 %v920_v18, %v919_v21  ;;  %v917_v25 = vadd.f32 %v7227_v22, %v5232_v10  ;;  %v5271_v10 = vld [vmem:[%s8759_s6 + $0xa8] sm:$0xff]  ;;  %v5276_v18 = vld [vmem:[%s8759_s6 + $0xd0] sm:$0xff]  ;;  %v5281_v21 = vld [vmem:[%s8761_s8 + $0x38] sm:$0xff] }
 0x2cf   :  { %v922_v26 = vmax.f32 %v918_v23, 0.0  ;;  %v6893_v14 = vpack.c.bf16 %v5272_v11, %v5271_v10  ;;  %v6901_v19 = vpack.c.bf16 %v5276_v18, %v5275_v17  ;;  %v5282_v22 = vld [vmem:[%s8761_s8 + $0x40] sm:$0xff]  ;;  %v5298_v23 = vld [vmem:[%s8761_s8 + $0xa8] sm:$0xff]  ;;  %v6927_v17 = vpack.c.bf16 %v5293_v13, %v5292_v12  ;;  %v5294_v18 = vld [vmem:[%s8761_s8 + $0x90] sm:$0xff] }
 0x2d0   :  { %v921_v29 = vmax.f32 %v917_v25, 0.0  ;;  %6818 = vmatprep.subr.bf16.mxu1 %v6817_v24  ;;  %6828 = vmatprep.subr.bf16.mxu0 %v6817_v24  ;;  %v5299_v25 = vld [vmem:[%s8761_s8 + $0xb0] sm:$0xff]  ;;  %v5320_v10 = vld [vmem:[%s8761_s8 + $0x148] sm:$0xff] }
 0x2d1   :  { %6820 = vmatpush3.bf16.msra.mxu1 %v6817_v24  ;;  %6830 = vmatpush3.bf16.msra.mxu0 %v6817_v24 }
 0x2d2   :  { %v6821_v30 = vpack.c.bf16 %v922_v26, %v921_v29  ;;  %v6933_v26 = vpack.c.bf16 %v5299_v25, %v5298_v23  ;;  %v5300_v29 = vld [vmem:[%s8761_s8 + $0xb8] sm:$0xff]  ;;  %v5296_v23 = vld [vmem:[%s8761_s8 + $0xa0] sm:$0xff]  ;;  %v5308_v25 = vld [vmem:[%s8761_s8 + $0xf0] sm:$0xff] }
 0x2d4   :  { %6823 = vmatprep.subr.msk.bf16.mxu1 %vm7521_vm3, %v6821_v30  ;;  %6833 = vmatprep.subr.msk.bf16.mxu0 %vm7521_vm3, %v6821_v30 }
 0x2d5   :  { %6826 = vmatpush3.bf16.msk.msra.mxu1 %vm7521_vm3, %v6821_v30  ;;  %6836 = vmatpush3.bf16.msk.msra.mxu0 %vm7521_vm3, %v6821_v30 }
 0x2d6   :  { %6862 = vmatprep.subr.bf16.mxu0 %v6817_v24  ;;  %6838 = vmatprep.subr.bf16.mxu1 %v6837_v31 }
 0x2d8   :  { %6126 = vmatmul.mubr.msk.f32.vlgmr.msra.gmra.mrb[4].mxu0 %vm284_vm4, %v5237_v34  ;;  %6115 = vmatmul.mubr.msk.f32.vlgmr.msra.gmra.mrb[20].mxu1 %vm284_vm4, %v924_v35  ;;  %v5286_v34 = vld [vmem:[%s8761_s8 + $0x60] sm:$0xff]  ;;  %v5302_v35 = vld [vmem:[%s8761_s8 + $0xc8] sm:$0xff] }
 0x2d9   :  { %6864 = vmatpush3.bf16.msra.mxu0 %v6817_v24  ;;  %6170 = vmatprep.mubr.msk.f32.mxu0 %vm284_vm4, %v5252_v36  ;;  %v6912_v36 = vpack.c.bf16 %v5286_v34, %v5285_v33  ;;  %v5323_v33 = vld [vmem:[%s8761_s8 + $0x158] sm:$0xff]  ;;  %v5312_v34 = vld [vmem:[%s8761_s8 + $0x110] sm:$0xff] }
 0x2da   :  { %6867 = vmatprep.subr.msk.bf16.mxu0 %vm7521_vm3, %v6821_v30  ;;  %6840 = vmatpush3.bf16.msra.mxu1 %v6837_v31  ;;  %v5301_v31 = vld [vmem:[%s8761_s8 + $0xc0] sm:$0xff] }
 0x2db   :  { %6842 = vmatprep.subr.bf16.mxu1 %v6841_v37  ;;  %v6936_v32 = vpack.c.bf16 %v5301_v31, %v5300_v29  ;;  %v5310_v29 = vld [vmem:[%s8761_s8 + $0x100] sm:$0xff] }
 0x2dd   :  { %6870 = vmatpush3.bf16.msk.msra.mxu0 %vm7521_vm3, %v6821_v30 }
 0x2de   :  { %6884 = vmatprep.subr.bf16.mxu0 %v6817_v24  ;;  %6844 = vmatpush3.bf16.msra.mxu1 %v6841_v37  ;;  %v5303_v37 = vld [vmem:[%s8761_s8 + $0xd0] sm:$0xff] }
 0x2df   :  { %6846 = vmatprep.subr.bf16.mxu1 %v6845_v40  ;;  %v6939_v38 = vpack.c.bf16 %v5303_v37, %v5302_v35  ;;  %v5325_v37 = vld [vmem:[%s8761_s8 + $0x168] sm:$0xff] }
 0x2e0   :  { %6171 = vmatmul.mubr.msk.f32.vlgmr.msra.gmra.mrb[6].mxu0 %vm284_vm4, %v5253_v41  ;;  %v5304_v41 = vld [vmem:[%s8761_s8 + $0xd8] sm:$0xff] }
 0x2e1   :  { %6886 = vmatpush3.bf16.msra.mxu0 %v6817_v24  ;;  %6198 = vmatprep.mubr.msk.f32.mxu0 %vm284_vm4, %v5266_v42  ;;  %v6906_v24 = vpack.c.bf16 %v5282_v22, %v5281_v21  ;;  %v2228_v42 = vld [vmem:[%s8788_s26] sm:$0x3]  ;;  %v5307_v22 = vld [vmem:[%s8761_s8 + $0xe8] sm:$0xff] }
 0x2e2   :  { %6889 = vmatprep.subr.msk.bf16.mxu0 %vm7521_vm3, %v6821_v30  ;;  %6848 = vmatpush3.bf16.msra.mxu1 %v6845_v40  ;;  %v5287_v40 = vld [vmem:[%s8761_s8 + $0x68] sm:$0xff]  ;;  %v5306_v21 = vld [vmem:[%s8761_s8 + $0xe0] sm:$0xff] }
 0x2e3   :  { %6140 = vmatprep.subr.mxu1 %v5247_v44  ;;  %2230 = vrot.lane.b32.xlu0 %v2228_v42, %s7362_s27  ;;  %v5327_v42 = vld [vmem:[%s8761_s8 + $0x178] sm:$0xff] }
 0x2e5   :  { %6892 = vmatpush3.bf16.msk.msra.mxu0 %vm7521_vm3, %v6821_v30  ;;  %v6909_v30 = vpack.c.bf16 %v5284_v28, %v5283_v27 }
 0x2e6   :  { %6141 = vmatpush3.msra.mxu1 %v5247_v44  ;;  %6905 = vmatprep.subr.bf16.mxu0 %v7359_v48 }
 0x2e7   :  { %6850 = vmatprep.subr.bf16.mxu1 %v6849_v47 }
 0x2e8   :  { %6199 = vmatmul.mubr.msk.f32.vlgmr.msra.gmra.mrb[8].mxu0 %vm284_vm4, %v5267_v43  ;;  %v5280_v43 = vld [vmem:[%s8760_s7] ss:$0 sm:$0xff]  ;;  %s7368_s7 = smov 104  }
 0x2e9   :  { %6907 = vmatpush3.bf16.msra.mxu0 %v6906_v24  ;;  %6232 = vmatprep.mubr.msk.f32.mxu0 %vm7360_vm5, %v7361_v39  ;;  %v6942_v24 = vpack.c.bf16 %v5307_v22, %v5306_v21 }
 0x2ea   :  { %6908 = vmatprep.subr.bf16.mxu0 %v7359_v48 }
 0x2ed   :  { %6910 = vmatpush3.bf16.msra.mxu0 %v6909_v30  ;;  %v5311_v30 = vld [vmem:[%s8761_s8 + $0x108] sm:$0xff] }
 0x2ee   :  { %6911 = vmatprep.subr.bf16.mxu0 %v7359_v48  ;;  %v6948_v31 = vpack.c.bf16 %v5311_v30, %v5310_v29  ;;  %v2254_v29 = vld [vmem:[%s8764_s11] sm:$0xf]  ;;  %s7365_s11 = smov 32  }
 0x2f1   :  { %6913 = vmatpush3.bf16.msra.mxu0 %v6912_v36  ;;  %v5324_v36 = vld [vmem:[%s8761_s8 + $0x160] sm:$0xff] }
 0x2f2   :  { %6230 = vmatprep.subr.mxu0 %v7361_v39 }
 0x2f5   :  { %6231 = vmatpush3.msra.mxu0 %v5287_v40  ;;  %v6963_v40 = vpack.c.bf16 %v5325_v37, %v5324_v36 }
 0x2f6   :  { %6914 = vmatprep.subr.bf16.mxu0 %v7359_v48 }
 0x3ab   :  { %v6127_v51 = vpop.f32.mrb[4].mxu0  ;;  %v6116_v52 = vpop.f32.mrb[20].mxu1 }
 0x3ac   :  { %v1091_v53 = vpop.f32.mrb[5].mxu0  ;;  %v1000_v55 = vpop.f32.mrb[21].mxu1 }
 0x3ad   :  { %6142 = vmatprep.mubr.msk.f32.mxu1 %vm75_vm0, %v1091_v53  ;;  %v5314_v53 = vld [vmem:[%s8761_s8 + $0x118] sm:$0xff] }
 0x3ae   :  { %6143 = vmatmul.mubr.msk.f32.vlgmr.msra.gmra.mrb[22].mxu1 %vm75_vm0, %v6127_v51  ;;  %v1635_v51 = vld [vmem:[%s8761_s8] sm:$0xff] }
 0x3af   :  { %6852 = vmatpush3.bf16.msra.mxu1 %v6849_v47  ;;  %6159 = vmatprep.mubr.msk.f32.mxu1 %vm75_vm0, %v1000_v55 }
 0x3b0   :  { %6854 = vmatprep.subr.bf16.mxu1 %v6853_v54 }
 0x3b3   :  { %6856 = vmatpush3.bf16.msra.mxu1 %v6853_v54  ;;  %v6172_v59 = vpop.f32.mrb[6].mxu0  ;;  %v5315_v54 = vld [vmem:[%s8761_s8 + $0x120] sm:$0xff] }
 0x3b4   :  { %6858 = vmatprep.subr.bf16.mxu1 %v6857_v58  ;;  %v1345_v60 = vpop.f32.mrb[7].mxu0  ;;  %v6951_v56 = vpack.c.bf16 %v5315_v54, %v5314_v53  ;;  %v2248_v54 = vld [vmem:[%s8763_s10 + $0x10] sm:$0xff] }
 0x3b7   :  { %6860 = vmatpush3.bf16.msra.mxu1 %v6857_v58  ;;  %v1638_v58 = vld [vmem:[%s8761_s8 + $0x18] sm:$0xff] }
 0x3b8   :  { %6157 = vmatprep.subr.mxu1 %v1015_v61  ;;  %v6918_v63 = vpack.c.bf16 %v1638_v58, %v1637_v57 }
 0x3bb   :  { %6158 = vmatpush3.msra.mxu1 %v1015_v61  ;;  %v6200_v6 = vpop.f32.mrb[8].mxu0 }
 0x3bc   :  { %6160 = vmatmul.mubr.msk.f32.vlgmr.msra.gmra.mrb[22].mxu1 %vm75_vm0, %v6116_v52  ;;  %6872 = vmatprep.subr.bf16.mxu1 %v6871_v2  ;;  %v1520_v7 = vpop.f32.mrb[9].mxu0  ;;  %v1636_v52 = vld [vmem:[%s8761_s8 + $0x8] sm:$0xff] }
 0x3bd   :  { %6874 = vmatpush3.bf16.msra.mxu1 %v6871_v2  ;;  %6187 = vmatprep.mubr.msk.f32.mxu1 %vm75_vm0, %v1345_v60  ;;  %v6915_v55 = vpack.c.bf16 %v1636_v52, %v1635_v51  ;;  %v5317_v60 = vld [vmem:[%s8761_s8 + $0x130] sm:$0xff]  ;;  %v1640_v2 = vld [vmem:[%s8761_s8 + $0x28] sm:$0xff]  ;;  %v2250_v51 = vld [vmem:[%s8763_s10 + $0x20] sm:$0xff] }
 0x3be   :  { %6876 = vmatprep.subr.bf16.mxu1 %v6875_v3  ;;  %v6921_v5 = vpack.c.bf16 %v1640_v2, %v1639_v1 }
 0x3c1   :  { %6878 = vmatpush3.bf16.msra.mxu1 %v6875_v3  ;;  %v5318_v3 = vld [vmem:[%s8761_s8 + $0x138] sm:$0xff] }
 0x3c2   :  { %6880 = vmatprep.subr.bf16.mxu1 %v6879_v8 }
 0x3c5   :  { %6882 = vmatpush3.bf16.msra.mxu1 %v6879_v8  ;;  %v5291_v8 = vld [vmem:[%s8761_s8 + $0x78] sm:$0xff] }
 0x3c6   :  { %6185 = vmatprep.subr.mxu1 %v5263_v9 }
 0x3c9   :  { %6186 = vmatpush3.msra.mxu1 %v5263_v9  ;;  %v1641_v9 = vld [vmem:[%s8761_s8 + $0x30] sm:$0xff] }
 0x3ca   :  { %6188 = vmatmul.mubr.msk.f32.vlgmr.msra.gmra.mrb[22].mxu1 %vm75_vm0, %v6172_v59  ;;  %6894 = vmatprep.subr.bf16.mxu1 %v6893_v14  ;;  %v5316_v59 = vld [vmem:[%s8761_s8 + $0x128] sm:$0xff] }
 0x3cb   :  { %6896 = vmatpush3.bf16.msra.mxu1 %v6893_v14  ;;  %6215 = vmatprep.mubr.msk.f32.mxu1 %vm75_vm0, %v1520_v7  ;;  %v6954_v0 = vpack.c.bf16 %v5317_v60, %v5316_v59  ;;  %v5290_v7 = vld [vmem:[%s8761_s8 + $0x70] sm:$0xff] }
 0x3cc   :  { %6898 = vmatprep.subr.bf16.mxu1 %v6897_v16  ;;  %v6924_v11 = vpack.c.bf16 %v5291_v8, %v5290_v7 }
 0x3cf   :  { %6900 = vmatpush3.bf16.msra.mxu1 %v6897_v16 }
 0x3d0   :  { %6902 = vmatprep.subr.bf16.mxu1 %v6901_v19 }
 0x3d3   :  { %6904 = vmatpush3.bf16.msra.mxu1 %v6901_v19  ;;  %v5295_v19 = vld [vmem:[%s8761_s8 + $0x98] sm:$0xff] }
 0x3d4   :  { %6213 = vmatprep.subr.mxu1 %v5277_v20 }
 0x3d7   :  { %6214 = vmatpush3.msra.mxu1 %v5277_v20  ;;  %v6930_v20 = vpack.c.bf16 %v5295_v19, %v5294_v18 }
 0x3d8   :  { %6216 = vmatmul.mubr.msk.f32.vlgmr.msra.gmra.mrb[22].mxu1 %vm75_vm0, %v6200_v6  ;;  %6932 = vmatprep.subr.bf16.mxu1 %v7359_v48  ;;  %v6957_v6 = vpack.c.bf16 %v5319_v4, %v5318_v3 }
 0x3d9   :  { %6934 = vmatpush3.bf16.msra.mxu1 %v6933_v26  ;;  %6283 = vmatprep.mubr.msk.f32.mxu1 %vm7360_vm5, %v7361_v39  ;;  %v5309_v26 = vld [vmem:[%s8761_s8 + $0xf8] sm:$0xff] }
 0x3da   :  { %6935 = vmatprep.subr.bf16.mxu1 %v7359_v48  ;;  %v6945_v28 = vpack.c.bf16 %v5309_v26, %v5308_v25  ;;  %v2256_v25 = vlaneseq }
 0x3dc   :  { %v2257_v26 = vshrl.u32 %v2256_v25, 7 }
 0x3dd   :  { %6937 = vmatpush3.bf16.msra.mxu1 %v6936_v32  ;;  %v5322_v32 = vld [vmem:[%s8761_s8 + $0x150] sm:$0xff] }
 0x3de   :  { %6938 = vmatprep.subr.bf16.mxu1 %v7359_v48  ;;  %v6960_v35 = vpack.c.bf16 %v5323_v33, %v5322_v32  ;;  %v2262_v30 = vsub.s32 1, %v2257_v26  ;;  %v7364_v32 = vmov 1983009808  }
 0x3df   :  { %v2433_v33 = vunpack.c.l.s4 %v7364_v32  ;;  %v5348_v32 = vld [vmem:[%s8765_s12 + $0x38] sm:$0xf] }
 0x3e0   :  { %v2263_v36 = vrot.slane %v2254_v29, %v2262_v30  ;;  %v5357_v30 = vld [vmem:[%s8766_s13 + $0x50] sm:$0xff] }
 0x3e1   :  { %6940 = vmatpush3.bf16.msra.mxu1 %v6939_v38 }
 0x3e2   :  { %6281 = vmatprep.subr.mxu1 %v7361_v39 }
 0x3e5   :  { %6282 = vmatpush3.msra.mxu1 %v5304_v41  ;;  %v5326_v41 = vld [vmem:[%s8761_s8 + $0x170] sm:$0xff] }
 0x3e6   :  { %6950 = vmatprep.subr.bf16.mxu1 %v7359_v48 }
 0x4ab   :  { %v6217_v44 = vpop.f32.mrb[22].mxu1 }
 0x4ac   :  { %v1628_v45 = vadd.f32 %v6217_v44, %v5280_v43  ;;  %v1609_v46 = vpop.f32.mrb[23].mxu1  ;;  %v5328_v44 = vld [vmem:[%s8761_s8 + $0x180] sm:$0xff]  ;;  %s7369_s8 = smov 88  }
 0x4ad   :  { %v1627_v47 = vadd.f32 %v5280_v43, %v1609_v46  ;;  %v6966_v43 = vpack.c.bf16 %v5327_v42, %v5326_v41  ;;  %v2247_v46 = vld [vmem:[%s8763_s10 + $0x8] sm:$0xff]  ;;  %v2434_v41 = vunpack.c.0.s8 %v2433_v33  ;;  %v2556_v33 = vld [vmem:[%s8765_s12 + $0x18] sm:$0xf] }
 0x4ae   :  { %v1630_v49 = vmax.f32 %v1628_v45, 0.0 }
 0x4af   :  { %v1629_v50 = vmax.f32 %v1627_v47, 0.0  ;;  %v2249_v47 = vld [vmem:[%s8763_s10 + $0x18] sm:$0xff] }
 0x4b0   :  { %1633 = vst.msk [vmem:[#allocation2 + $0x8] sm:$0x3f] %vm1632_vm6, %v1630_v49  ;;  %vm2557_vm6 = vcmask 113664  }
 0x4b1   :  { %1631 = vst.msk [vmem:[#allocation2] sm:$0xff] %vm75_vm0, %v1629_v50  ;;  %v2253_v50 = vld [vmem:[%s8763_s10 + $0x38] sm:$0xff] }
 0x4b2   :  { %v6972_v52 = vpack.c.bf16 %v2253_v50, %v2249_v47 }
 0x4b7   :  { %v2046_v16 = vld [vmem:[#allocation2 + $0xa] sm:$0x3]  ;;  %v1963_v38 = vld [vmem:[#allocation2 + $0x8] sm:$0x3]  ;;  %v2129_v45 = vld [vmem:[#allocation2 + $0xc] sm:$0x3] }
 0x4b8   :  { %v1642_v61 = vld [vmem:[#allocation2 + $0x2] sm:$0x3]  ;;  %v1880_v62 = vld [vmem:[#allocation2 + $0x6] sm:$0x3]  ;;  %v1634_v14 = vld [vmem:[#allocation2] sm:$0x3] }
 0x4b9   :  { %6233 = vmatmul.mubr.msk.f32.vlgmr.msra.gmra.mrb[10].mxu0 %vm75_vm0, %v1642_v61  ;;  %6284 = vmatmul.mubr.msk.f32.vlgmr.msra.gmra.mrb[24].mxu1 %vm75_vm0, %v1880_v62  ;;  %v1797_v27 = vld [vmem:[#allocation2 + $0x4] sm:$0x3] }
 0x4ba   :  { %6916 = vmatpush3.bf16.msra.mxu0 %v6915_v55  ;;  %6952 = vmatpush3.bf16.msra.mxu1 %v6951_v56  ;;  %v2252_v55 = vld [vmem:[%s8763_s10 + $0x30] sm:$0xff] }
 0x4bb   :  { %6917 = vmatprep.subr.bf16.mxu0 %v7359_v48  ;;  %6953 = vmatprep.subr.bf16.mxu1 %v7359_v48  ;;  %v6974_v56 = vpack.c.bf16 %v2252_v55, %v2248_v54 }
 0x4bc   :  { %6249 = vmatprep.mubr.msk.f32.mxu0 %vm7360_vm5, %v7361_v39  ;;  %6317 = vmatprep.mubr.msk.f32.mxu1 %vm7360_vm5, %v7361_v39 }
 0x4be   :  { %6919 = vmatpush3.bf16.msra.mxu0 %v6918_v63  ;;  %6955 = vmatpush3.bf16.msra.mxu1 %v6954_v0 }
 0x4bf   :  { %6920 = vmatprep.subr.bf16.mxu0 %v7359_v48  ;;  %6956 = vmatprep.subr.bf16.mxu1 %v7359_v48 }
 0x4c2   :  { %6922 = vmatpush3.bf16.msra.mxu0 %v6921_v5  ;;  %6958 = vmatpush3.bf16.msra.mxu1 %v6957_v6 }
 0x4c3   :  { %6247 = vmatprep.subr.mxu0 %v7361_v39  ;;  %6315 = vmatprep.subr.mxu1 %v7361_v39 }
 0x4c6   :  { %6248 = vmatpush3.msra.mxu0 %v1641_v9  ;;  %6316 = vmatpush3.msra.mxu1 %v5320_v10 }
 0x4c7   :  { %6250 = vmatmul.mubr.msk.f32.vlgmr.msra.gmra.mrb[12].mxu0 %vm75_vm0, %v1634_v14  ;;  %6923 = vmatprep.subr.bf16.mxu0 %v7359_v48 }
 0x4c8   :  { %6318 = vmatmul.mubr.msk.f32.vlgmr.msra.gmra.mrb[26].mxu1 %vm75_vm0, %v2046_v16  ;;  %6925 = vmatpush3.bf16.msra.mxu0 %v6924_v11  ;;  %v5330_v11 = vld [vmem:[%s8762_s9] ss:$0 sm:$0xff]  ;;  %s7363_s9 = smov 112  }
 0x4c9   :  { %6926 = vmatprep.subr.bf16.mxu0 %v7359_v48  ;;  %6266 = vmatprep.mubr.msk.f32.mxu0 %vm7360_vm5, %v7361_v39 }
 0x4ca   :  { %2415 = vmatprep.mubr.f32.mxu1 %v7361_v39  ;;  %6973 = vmatprep.subr.bf16.mxu1 %v6972_v52 }
 0x4cb   :  { %6975 = vmatpush1.bf16.msra.mxu1 %v6974_v56 }
 0x4cc   :  { %6928 = vmatpush3.bf16.msra.mxu0 %v6927_v17 }
 0x4cd   :  { %6929 = vmatprep.subr.bf16.mxu0 %v7359_v48 }
 0x4d0   :  { %6931 = vmatpush3.bf16.msra.mxu0 %v6930_v20  ;;  %v2231_v20 = vpop.permute.xlu0 %2230 }
 0x4d1   :  { %6264 = vmatprep.subr.mxu0 %v7361_v39 }
 0x4d4   :  { %6265 = vmatpush3.msra.mxu0 %v5296_v23 }
 0x4d5   :  { %6267 = vmatmul.mubr.msk.f32.vlgmr.msra.gmra.mrb[14].mxu0 %vm75_vm0, %v1797_v27  ;;  %6941 = vmatprep.subr.bf16.mxu0 %v7359_v48  ;;  %v2258_v27 = vsub.s32 0, %v2257_v26 }
 0x4d6   :  { %6943 = vmatpush3.bf16.msra.mxu0 %v6942_v24  ;;  %6300 = vmatprep.mubr.msk.f32.mxu0 %vm7360_vm5, %v7361_v39 }
 0x4d7   :  { %6944 = vmatprep.subr.bf16.mxu0 %v7359_v48 }
 0x4da   :  { %6946 = vmatpush3.bf16.msra.mxu0 %v6945_v28  ;;  %v2266_v28 = vsub.s32 2, %v2257_v26 }
 0x4db   :  { %6947 = vmatprep.subr.bf16.mxu0 %v7359_v48 }
 0x4de   :  { %6949 = vmatpush3.bf16.msra.mxu0 %v6948_v31  ;;  %v2270_v31 = vsub.s32 3, %v2257_v26 }
 0x4df   :  { %6298 = vmatprep.subr.mxu0 %v7361_v39 }
 0x4e0   :  { %v2271_v37 = vrot.slane %v2254_v29, %v2270_v31  ;;  %v2555_v31 = vld [vmem:[%s8765_s12 + $0x10] sm:$0xff] }
 0x4e2   :  { %6299 = vmatpush3.msra.mxu0 %v5312_v34  ;;  %v2259_v34 = vrot.slane %v2254_v29, %v2258_v27  ;;  %v2554_v27 = vld [vmem:[%s8765_s12 + $0x8] sm:$0xff] }
 0x4e3   :  { %6301 = vmatmul.mubr.msk.f32.vlgmr.msra.gmra.mrb[16].mxu0 %vm75_vm0, %v1963_v38  ;;  %6959 = vmatprep.subr.bf16.mxu0 %v7359_v48 }
 0x4e4   :  { %6961 = vmatpush3.bf16.msra.mxu0 %v6960_v35  ;;  %6334 = vmatprep.mubr.msk.f32.mxu0 %vm7360_vm5, %v7361_v39  ;;  %v2267_v35 = vrot.slane %v2254_v29, %v2266_v28  ;;  %vm2457_vm5 = vcmask 451584   ;;  %v5347_v28 = vld [vmem:[%s8765_s12 + $0x30] sm:$0xff]  ;;  %v5356_v29 = vld [vmem:[%s8766_s13 + $0x48] sm:$0xff] }
 0x4e5   :  { %6962 = vmatprep.subr.bf16.mxu0 %v7359_v48 }
 0x4e8   :  { %6964 = vmatpush3.bf16.msra.mxu0 %v6963_v40 }
 0x4e9   :  { %6965 = vmatprep.subr.bf16.mxu0 %v7359_v48  ;;  %v2251_v48 = vld [vmem:[%s8763_s10 + $0x28] sm:$0xff] }
 0x4ea   :  { %v6968_v49 = vpack.c.bf16 %v2251_v48, %v2247_v46 }
 0x4ec   :  { %6967 = vmatpush3.bf16.msra.mxu0 %v6966_v43 }
 0x4ed   :  { %6332 = vmatprep.subr.mxu0 %v7361_v39 }
 0x4f0   :  { %6333 = vmatpush3.msra.mxu0 %v5328_v44 }
 0x4f1   :  { %6335 = vmatmul.mubr.msk.f32.vlgmr.msra.gmra.mrb[18].mxu0 %vm75_vm0, %v2129_v45  ;;  %6969 = vmatprep.subr.bf16.mxu0 %v6968_v49 }
 0x4f2   :  { %2344 = vmatprep.mubr.f32.mxu0 %v7361_v39  ;;  %v2246_v39 = vld [vmem:[%s8763_s10] sm:$0xff] }
 0x4f3   :  { %v6970_v53 = vpack.c.bf16 %v2250_v51, %v2246_v39  ;;  %v2437_v39 = vsub.s32 %v2434_v41, %v2257_v26  ;;  %v5346_v26 = vld [vmem:[%s8765_s12 + $0x28] sm:$0xff]  ;;  %v5371_v41 = vld [vmem:[%s8765_s12 + $0x50] sm:$0xff] }
 0x4f5   :  { %6971 = vmatpush1.bf16.msra.mxu0 %v6970_v53 }
 0x58c   :  { %v1720_v57 = vpop.f32.mrb[10].mxu0  ;;  %v1958_v58 = vpop.f32.mrb[24].mxu1 }
 0x58d   :  { %v6234_v59 = vpop.f32.mrb[11].mxu0  ;;  %v6285_v60 = vpop.f32.mrb[25].mxu1 }
 0x59a   :  { %v1793_v61 = vpop.f32.mrb[12].mxu0 }
 0x59b   :  { %v1794_v62 = vadd.f32 %v1793_v61, %v1720_v57  ;;  %v2124_v63 = vpop.f32.mrb[26].mxu1  ;;  %v6251_v0 = vpop.f32.mrb[13].mxu0 }
 0x59c   :  { %v6319_v1 = vpop.f32.mrb[27].mxu1 }
 0x5a8   :  { %v1875_v2 = vpop.f32.mrb[14].mxu0 }
 0x5a9   :  { %v1879_v3 = vadd.f32 %v1875_v2, %v1794_v62  ;;  %v6268_v4 = vpop.f32.mrb[15].mxu0 }
 0x5aa   :  { %v2553_v4 = vld [vmem:[%s8765_s12] sm:$0xff] }
 0x5ab   :  { %v1962_v5 = vadd.f32 %v1958_v58, %v1879_v3  ;;  %v5345_v3 = vld [vmem:[%s8765_s12 + $0x20] sm:$0xff] }
 0x5b6   :  { %v2041_v6 = vpop.f32.mrb[16].mxu0 }
 0x5b7   :  { %v2045_v7 = vadd.f32 %v2041_v6, %v1962_v5  ;;  %v6302_v8 = vpop.f32.mrb[17].mxu0 }
 0x5b9   :  { %v2128_v9 = vadd.f32 %v2124_v63, %v2045_v7 }
 0x5c4   :  { %v2207_v10 = vpop.f32.mrb[18].mxu0 }
 0x5c5   :  { %v2211_v12 = vadd.f32 %v2207_v10, %v2128_v9  ;;  %v6336_v13 = vpop.f32.mrb[19].mxu0 }
 0x5c7   :  { %v2219_v14 = vadd.f32 %v5330_v11, %v2211_v12 }
 0x5c9   :  { %2221 = vst.msk [vmem:[#allocation3] sm:$0x3] %vm2220_vm7, %v2219_v14  ;;  %vm2516_vm7 = vcmask 261120  }
 0x5d0   :  { %v8063_v16 = vld [vmem:[#allocation3] sm:$0x3] }
 0x5d1   :  { %v5331_v17 = vclamps-f32 %v8063_v16, 4.0  ;;  %2240 = vst.msk [vmem:[#allocation6] sm:$0x3] %vm2239_vm8, %v8063_v16 }
 0x5d3   :  { %v2225_v18 = vmul.f32 0.5, %v5331_v17 }
 0x5d5   :  { %v2226_v19 = vmul.f32 1.442695, %v2225_v18 }
 0x5d7   :  { %7292 = vpow2.f32 %v2226_v19  ;;  %v5354_v19 = vld [vmem:[%s8766_s13 + $0x38] sm:$0xff] }
 0x5e1   :  { %v7293_v21 = vpop.eup %7292 }
 0x5e2   :  { %v2233_v22 = vmul.f32 %v7293_v21, %v2231_v20  ;;  %v5355_v20 = vld [vmem:[%s8766_s13 + $0x40] sm:$0xff] }
 0x5e3   :  { %v6988_v25 = vpack.c.bf16 %v5355_v20, %v5354_v19  ;;  %v5384_v19 = vld [vmem:[%s8766_s13 + $0xa0] sm:$0xff]  ;;  %v5398_v20 = vld [vmem:[%s8766_s13 + $0xa8] sm:$0xff] }
 0x5e4   :  { %2235 = vrot.lane.b32.xlu0 %v2233_v22, %s7363_s9 }
 0x656   :  { %v2236_v23 = vpop.permute.xlu0 %2235 }
 0x657   :  { %v2238_v24 = vadd.f32 %v2236_v23, %v8063_v16  ;;  %v5401_v23 = vld [vmem:[%s8766_s13 + $0xc0] sm:$0xff] }
 0x659   :  { %5332 = vmatmul.mubr.msk.f32.vlgmr.msra.gmra.mrb[20].mxu0 %vm2276_vm9, %v2238_v24  ;;  %5333 = vmatmul.mubr.msk.f32.vlgmr.msra.gmra.mrb[28].mxu1 %vm2276_vm9, %v2238_v24 }
 0x65a   :  { %6351 = vmatprep.mubr.msk.f32.mxu1 %vm2557_vm6, %v5345_v3  ;;  %6341 = vmatprep.mubr.msk.f32.mxu0 %vm2557_vm6, %v2553_v4  ;;  %v5378_v3 = vld [vmem:[%s8766_s13 + $0x70] sm:$0xff]  ;;  %v5379_v4 = vld [vmem:[%s8766_s13 + $0x78] sm:$0xff] }
 0x72c   :  { %v2346_v38 = vpop.f32.mrb[20].mxu0  ;;  %v2417_v40 = vpop.f32.mrb[28].mxu1 }
 0x72d   :  { %v2347_v42 = vadd.f32 %v2346_v38, %v2259_v34  ;;  %v2418_v43 = vadd.f32 %v2417_v40, %v2267_v35  ;;  %v2348_v44 = vpop.f32.mrb[21].mxu0  ;;  %v2419_v45 = vpop.f32.mrb[29].mxu1  ;;  %v6992_v34 = vpack.c.bf16 %v5357_v30, %v5356_v29  ;;  %v5358_v35 = vld [vmem:[%s8766_s13 + $0x58] sm:$0xff]  ;;  %v5370_v40 = vld [vmem:[%s8765_s12 + $0x48] sm:$0xff]  ;;  %v3407_v30 = vld [vmem:[%s8768_s15] sm:$0xff] }
 0x72e   :  { %v2349_v46 = vadd.f32 %v2348_v44, %v2263_v36  ;;  %v2420_v48 = vadd.f32 %v2419_v45, %v2271_v37  ;;  %v5359_v36 = vld [vmem:[%s8766_s13 + $0x60] sm:$0xff]  ;;  %v5390_v44 = vld [vmem:[%s8765_s12 + $0x68] sm:$0xff]  ;;  %v5391_v45 = vld [vmem:[%s8765_s12 + $0x70] sm:$0xff] }
 0x72f   :  { %v2422_v47 = vmax.f32 %v2347_v42, 0.0  ;;  %v2424_v49 = vmax.f32 %v2418_v43, 0.0  ;;  %v5369_v37 = vld [vmem:[%s8765_s12 + $0x40] sm:$0xff]  ;;  %v6996_v38 = vpack.c.bf16 %v5359_v36, %v5358_v35  ;;  %v5372_v42 = vld [vmem:[%s8765_s12 + $0x58] sm:$0xf] }
 0x730   :  { %v2423_v50 = vmax.f32 %v2349_v46, 0.0  ;;  %v2425_v51 = vmax.f32 %v2420_v48, 0.0  ;;  %v5389_v43 = vld [vmem:[%s8765_s12 + $0x60] sm:$0xff]  ;;  %v5392_v46 = vld [vmem:[%s8765_s12 + $0x78] sm:$0xf]  ;;  %v5360_v48 = vld [vmem:[%s8766_s13 + $0x68] sm:$0xff] }
 0x731   :  { %v5404_v29 = vld [vmem:[%s8766_s13 + $0xd8] sm:$0xff] }
 0x732   :  { %v2430_v52 = vcombine.low %v2422_v47, %v2423_v50  ;;  %v2431_v53 = vcombine.low %v2424_v49, %v2425_v51  ;;  %v2659_v47 = vld [vmem:[%s8766_s13] sm:$0xff]  ;;  %v2660_v49 = vld [vmem:[%s8766_s13 + $0x8] sm:$0xff]  ;;  %v2662_v51 = vld [vmem:[%s8766_s13 + $0x18] sm:$0xff] }
 0x733   :  { %v7000_v50 = vpack.c.bf16 %v2660_v49, %v2659_v47  ;;  %v3408_v47 = vld [vmem:[%s8768_s15 + $0x8] sm:$0xff] }
 0x734   :  { %v2438_v54 = vrot.slane %v2430_v52, %v2437_v39  ;;  %v2445_v55 = vrot.slane %v2431_v53, %v2437_v39  ;;  %v2661_v39 = vld [vmem:[%s8766_s13 + $0x10] sm:$0xff]  ;;  %v5440_v49 = vld [vmem:[%s8768_s15 + $0x48] sm:$0xff] }
 0x736   :  { %v2446_v56 = vcombine.low %v2438_v54, %v2445_v55  ;;  %v7004_v55 = vpack.c.bf16 %v2662_v51, %v2661_v39  ;;  %v5441_v39 = vld [vmem:[%s8768_s15 + $0x50] sm:$0xff]  ;;  %v5424_v51 = vld [vmem:[%s8769_s16 + $0x38] sm:$0xff] }
 0x738   :  { %2455 = vst.msk [vmem:[#allocation4] sm:$0xff] %vm2454_vm1, %v2446_v56 }
 0x73f   :  { %v5337_v57 = vld.sshfl [vmem:[#allocation4 + $0x2] sm:$0x33 pattern:$0x76325410]  ;;  %v2456_v58 = vld [vmem:[#allocation4] sm:$0x3] }
 0x740   :  { %2512 = vrot.lane.b32.xlu0 %v5337_v57, %s7365_s11  ;;  %v5335_v59 = vld.sshfl [vmem:[#allocation4] sm:$0x33 pattern:$0x76325410]  ;;  %2458 = vst.msk [vmem:[#allocation5] sm:$0x3] %vm2457_vm5, %v2456_v58  ;;  %v2511_v62 = vcombine.high %v5337_v57, %v5337_v57 }
 0x741   :  { %2482 = vrot.lane.b32.xlu1 %v5335_v59, %s7362_s27  ;;  %v2481_v60 = vcombine.high %v5335_v59, %v5335_v59  ;;  %v5339_v61 = vld.sshfl [vmem:[#allocation4 + $0x4] sm:$0x33 pattern:$0x76325410]  ;;  %v2663_v57 = vld [vmem:[%s8766_s13 + $0x20] sm:$0xff]  ;;  %v2664_v58 = vld [vmem:[%s8766_s13 + $0x28] sm:$0xff] }
 0x742   :  { %v5334_v63 = vld.sshfl [vmem:[#allocation4] sm:$0x3 pattern:$0x76325410]  ;;  %v2542_v0 = vcombine.high %v5339_v61, %v5339_v61 }
 0x743   :  { %v5338_v1 = vld.sshfl [vmem:[#allocation4 + $0x4] sm:$0x3 pattern:$0x76325410] }
 0x744   :  { %2543 = vrot.lane.b32.xlu0 %v5339_v61, %s7366_s2  ;;  %v5336_v2 = vld.sshfl [vmem:[#allocation4 + $0x2] sm:$0x3 pattern:$0x76325410] }
 0x745   :  { %2484 = vrot.lane.b32.xlu1 %v2481_v60, %s7362_s27 }
 0x748   :  { %2468 = vrot.lane.b32.xlu0 %v5334_v63, %s7367_s21 }
 0x749   :  { %2514 = vrot.lane.b32.xlu1 %v2511_v62, %s7365_s11  ;;  %v7008_v62 = vpack.c.bf16 %v2664_v58, %v2663_v57  ;;  %v5459_v57 = vld [vmem:[%s8768_s15 + $0x60] sm:$0xff]  ;;  %v5416_v58 = vld [vmem:[%s8768_s15 + $0x28] sm:$0xff] }
 0x74c   :  { %2529 = vrot.lane.b32.xlu0 %v5338_v1, %s7368_s7 }
 0x74d   :  { %2545 = vrot.lane.b32.xlu1 %v2542_v0, %s7366_s2 }
 0x751   :  { %2498 = vrot.lane.b32.xlu1 %v5336_v2, %s7369_s8  ;;  %v2665_v2 = vld [vmem:[%s8766_s13 + $0x30] sm:$0xff] }
 0x755   :  { %2242 = vrot.lane.b32.xlu1 %v5331_v17, %s7363_s9 }
 0x7b2   :  { %v2513_v5 = vpop.permute.xlu0 %2512 }
 0x7b3   :  { %v2483_v6 = vpop.permute.xlu1 %2482 }
 0x7b6   :  { %v2544_v7 = vpop.permute.xlu0 %2543 }
 0x7b7   :  { %v2485_v8 = vpop.permute.xlu1 %2484 }
 0x7b8   :  { %v2486_v9 = vsel %vm2276_vm9, %v2483_v6, %v2485_v8  ;;  %vm2570_vm9 = vcmask 1045504   ;;  %v5381_v6 = vld [vmem:[%s8766_s13 + $0x88] sm:$0xff]  ;;  %v7018_v8 = vpack.c.bf16 %v5379_v4, %v5378_v3  ;;  %v5427_v3 = vld [vmem:[%s8769_s16 + $0x50] sm:$0xff] }
 0x7b9   :  { %2488 = vst.msk [vmem:[#allocation5 + $0x4] sm:$0x3] %vm2457_vm5, %v2486_v9  ;;  %vm8106_vm11 = vmpackc.low %vm2570_vm9, %vm7358_vm2  ;;  %vm4274_vm2 = vcmask 224256  }
 0x7ba   :  { %v2469_v10 = vpop.permute.xlu0 %2468 }
 0x7bb   :  { %v2515_v11 = vpop.permute.xlu1 %2514  ;;  %2471 = vst.msk [vmem:[#allocation5 + $0x2] sm:$0x3] %vm2457_vm5, %v2469_v10 }
 0x7bc   :  { %v2517_v12 = vsel %vm2516_vm7, %v2513_v5, %v2515_v11  ;;  %v5380_v5 = vld [vmem:[%s8766_s13 + $0x80] sm:$0xff]  ;;  %v5382_v11 = vld [vmem:[%s8766_s13 + $0x90] sm:$0xff] }
 0x7bd   :  { %2519 = vst.msk [vmem:[#allocation5 + $0x8] sm:$0x3] %vm2457_vm5, %v2517_v12  ;;  %v7022_v10 = vpack.c.bf16 %v5381_v6, %v5380_v5  ;;  %v5383_v12 = vld [vmem:[%s8766_s13 + $0x98] sm:$0xff]  ;;  %v5429_v6 = vld [vmem:[%s8769_s16 + $0x60] sm:$0xff] }
 0x7be   :  { %v2530_v13 = vpop.permute.xlu0 %2529  ;;  %v5428_v5 = vld [vmem:[%s8769_s16 + $0x58] sm:$0xff] }
 0x7bf   :  { %v2546_v14 = vpop.permute.xlu1 %2545  ;;  %2532 = vst.msk [vmem:[#allocation5 + $0xa] sm:$0x3] %vm2457_vm5, %v2530_v13 }
 0x7c0   :  { %v2548_v16 = vsel %vm2547_vm10, %v2544_v7, %v2546_v14 }
 0x7c1   :  { %2550 = vst.msk [vmem:[#allocation5 + $0xc] sm:$0x3] %vm2457_vm5, %v2548_v16  ;;  %v7026_v16 = vpack.c.bf16 %v5383_v12, %v5382_v11  ;;  %v5489_v11 = vld [vmem:[%s8768_s15 + $0xa0] sm:$0xff]  ;;  %v5490_v12 = vld [vmem:[%s8768_s15 + $0xa8] sm:$0xff] }
 0x7c3   :  { %v2499_v17 = vpop.permute.xlu1 %2498 }
 0x7c4   :  { %2501 = vst.msk [vmem:[#allocation5 + $0x6] sm:$0x3] %vm2457_vm5, %v2499_v17 }
 0x7c7   :  { %v2243_v18 = vpop.permute.xlu1 %2242 }
 0x7c8   :  { %2245 = vst.msk [vmem:[#allocation8] sm:$0x3] %vm2239_vm8, %v2243_v18  ;;  %v2552_v22 = vld [vmem:[#allocation5 + $0x8] sm:$0x3f] }
 0x7cb   :  { %v2551_v21 = vld [vmem:[#allocation5] sm:$0xff] }
 0x7cc   :  { %v6976_v24 = vpack.c.bf16 %v2552_v22, %v2551_v21  ;;  %v5399_v21 = vld [vmem:[%s8766_s13 + $0xb0] sm:$0xff]  ;;  %v5400_v22 = vld [vmem:[%s8766_s13 + $0xb8] sm:$0xff] }
 0x7ce   :  { %6978 = vmatprep.subr.msk.bf16.mxu0 %vm8106_vm11, %v6976_v24  ;;  %6984 = vmatprep.subr.msk.bf16.mxu1 %vm8106_vm11, %v6976_v24 }
 0x7cf   :  { %6981 = vmatpush3.bf16.msk.msra.mxu0 %vm8106_vm11, %v6976_v24  ;;  %6987 = vmatpush3.bf16.msk.msra.mxu1 %vm8106_vm11, %v6976_v24 }
 0x7d0   :  { %7014 = vmatprep.subr.msk.bf16.mxu1 %vm8106_vm11, %v6976_v24  ;;  %6989 = vmatprep.subr.bf16.mxu0 %v6988_v25 }
 0x7d2   :  { %6352 = vmatmul.mubr.msk.f32.vlgmr.msra.gmra.mrb[30].mxu1 %vm2557_vm6, %v5346_v26  ;;  %6342 = vmatmul.mubr.msk.f32.vlgmr.msra.gmra.mrb[22].mxu0 %vm2557_vm6, %v2554_v27  ;;  %v5402_v26 = vld [vmem:[%s8766_s13 + $0xc8] sm:$0xff]  ;;  %v5403_v27 = vld [vmem:[%s8766_s13 + $0xd0] sm:$0xff]  ;;  %s7370_s13 = smov [#allocation6]  }
 0x7d3   :  { %7017 = vmatpush3.bf16.msk.msra.mxu1 %vm8106_vm11, %v6976_v24  ;;  %6354 = vmatprep.mubr.msk.f32.mxu1 %vm2557_vm6, %v5347_v28  ;;  %v7044_v28 = vpack.c.bf16 %v5403_v27, %v5402_v26  ;;  %v3513_v27 = vld [vmem:[%s8769_s16 + $0x10] sm:$0xff]  ;;  %s5148_s27 = sshll.u32 %s7370_s13, 4  ;;  %s5149_s27 = int_to_ptr.vmem [resolvable:$true] %s5148_s27 }
 0x7d4   :  { %7032 = vmatprep.subr.msk.bf16.mxu1 %vm8106_vm11, %v6976_v24  ;;  %6344 = vmatprep.mubr.msk.f32.mxu0 %vm2557_vm6, %v2555_v31  ;;  %v5439_v31 = vld [vmem:[%s8768_s15 + $0x40] sm:$0xff]  ;;  %s7310_s24 = scalar_lea.vmem %s5149_s27, 32  ;;  %p7315_p1 = scmp.lt.s32.totalorder %s5149_s27, %s5149_s27 }
 0x7d5   :  { %6991 = vmatpush3.bf16.msra.mxu0 %v6988_v25  ;;  %v7040_v25 = vpack.c.bf16 %v5401_v23, %v5400_v22  ;;  %p7311_p0 = scmp.ne.s32.totalorder %s5149_s27, %s7310_s24  ;;  %p7316_p2 = scmp.lt.s32.totalorder %s7310_s24, %s7310_s24 }
 0x7d6   :  { %6355 = vmatmul.mubr.msk.f32.gmra.mrb[32].mxu1 %vm2557_vm6, %v5348_v32  ;;  %6345 = vmatmul.mubr.msk.f32.gmra.mrb[24].mxu0 %vm2557_vm6, %v2556_v33  ;;  %v5409_v32 = vld [vmem:[%s8767_s14] ss:$0 sm:$0xff] }
 0x7d7   :  { %6401 = vmatprep.mubr.msk.f32.mxu1 %vm2557_vm6, %v5369_v37  ;;  %6993 = vmatprep.subr.bf16.mxu0 %v6992_v34  ;;  %p7317_p3 = por %p7316_p2, %p7315_p1 }
 0x7d9   :  { %6995 = vmatpush3.bf16.msra.mxu0 %v6992_v34  ;;  %p7318_p4 = pnand %p7317_p3, %p7311_p0 }
 0x7da   :  { %6402 = vmatmul.mubr.msk.f32.vlgmr.msra.gmra.mrb[34].mxu1 %vm2557_vm6, %v5370_v40  ;;  %6997 = vmatprep.subr.bf16.mxu0 %v6996_v38 }
 0x7db   :  { %7035 = vmatpush3.bf16.msk.msra.mxu1 %vm8106_vm11, %v6976_v24  ;;  %6404 = vmatprep.mubr.msk.f32.mxu1 %vm2557_vm6, %v5371_v41  ;;  %v7036_v24 = vpack.c.bf16 %v5399_v21, %v5398_v20 }
 0x7dd   :  { %6999 = vmatpush3.bf16.msra.mxu0 %v6996_v38 }
 0x7de   :  { %6405 = vmatmul.mubr.msk.f32.gmra.mrb[36].mxu1 %vm2557_vm6, %v5372_v42  ;;  %6369 = vmatprep.subr.mxu0 %v5360_v48 }
 0x7df   :  { %6431 = vmatprep.mubr.msk.f32.mxu1 %vm2557_vm6, %v5389_v43 }
 0x7e1   :  { %6370 = vmatpush3.msra.mxu0 %v5360_v48 }
 0x7e2   :  { %6432 = vmatmul.mubr.msk.f32.vlgmr.msra.gmra.mrb[38].mxu1 %vm2557_vm6, %v5390_v44  ;;  %7001 = vmatprep.subr.bf16.mxu0 %v7000_v50 }
 0x7e3   :  { %6434 = vmatprep.mubr.msk.f32.mxu1 %vm2557_vm6, %v5391_v45 }
 0x7e6   :  { %6435 = vmatmul.mubr.msk.f32.gmra.mrb[40].mxu1 %vm2557_vm6, %v5392_v46 }
 0x7e7   :  { %6465 = vmatprep.mubr.msk.f32.mxu1 %vm284_vm4, %v3407_v30 }
 0x8a5   :  { %v6353_v52 = vpop.f32.mrb[30].mxu1  ;;  %v6343_v53 = vpop.f32.mrb[22].mxu0 }
 0x8a6   :  { %v2749_v54 = vpop.f32.mrb[31].mxu1  ;;  %v2640_v56 = vpop.f32.mrb[23].mxu0 }
 0x8a7   :  { %6371 = vmatprep.mubr.msk.f32.mxu0 %vm75_vm0, %v2749_v54  ;;  %v5442_v54 = vld [vmem:[%s8768_s15 + $0x58] sm:$0xf] }
 0x8a8   :  { %6372 = vmatmul.mubr.msk.f32.vlgmr.msra.gmra.mrb[26].mxu0 %vm75_vm0, %v6353_v52  ;;  %v5425_v52 = vld [vmem:[%s8769_s16 + $0x40] sm:$0xff] }
 0x8a9   :  { %7003 = vmatpush3.bf16.msra.mxu0 %v7000_v50  ;;  %v6356_v59 = vpop.f32.mrb[32].mxu1  ;;  %v6346_v60 = vpop.f32.mrb[24].mxu0  ;;  %v3409_v50 = vld [vmem:[%s8768_s15 + $0x10] sm:$0xff] }
 0x8aa   :  { %7005 = vmatprep.subr.bf16.mxu0 %v7004_v55  ;;  %v2759_v61 = vpop.f32.mrb[33].mxu1  ;;  %v2650_v63 = vpop.f32.mrb[25].mxu0 }
 0x8ab   :  { %6374 = vmatprep.mubr.msk.f32.mxu0 %vm75_vm0, %v2759_v61  ;;  %v5461_v61 = vld [vmem:[%s8768_s15 + $0x70] sm:$0xff] }
 0x8ac   :  { %6375 = vmatmul.mubr.msk.f32.gmra.mrb[28].mxu0 %vm75_vm0, %v6356_v59  ;;  %v5460_v59 = vld [vmem:[%s8768_s15 + $0x68] sm:$0xff] }
 0x8ad   :  { %7007 = vmatpush3.bf16.msra.mxu0 %v7004_v55  ;;  %6391 = vmatprep.mubr.msk.f32.mxu0 %vm75_vm0, %v2640_v56  ;;  %v6403_v0 = vpop.f32.mrb[34].mxu1  ;;  %v5415_v55 = vld [vmem:[%s8768_s15 + $0x20] sm:$0xff]  ;;  %v7068_v56 = vpack.c.bf16 %v5425_v52, %v5424_v51  ;;  %v5452_v52 = vld [vmem:[%s8769_s16 + $0x90] sm:$0xff] }
 0x8ae   :  { %7009 = vmatprep.subr.bf16.mxu0 %v7008_v62  ;;  %v3053_v1 = vpop.f32.mrb[35].mxu1 }
 0x8b1   :  { %7011 = vmatpush3.bf16.msra.mxu0 %v7008_v62  ;;  %v6406_v7 = vpop.f32.mrb[36].mxu1  ;;  %v5418_v62 = vld [vmem:[%s8768_s15 + $0x38] sm:$0xf] }
 0x8b2   :  { %6389 = vmatprep.subr.mxu0 %v2665_v2  ;;  %v3063_v9 = vpop.f32.mrb[37].mxu1 }
 0x8b5   :  { %6390 = vmatpush3.msra.mxu0 %v2665_v2  ;;  %v6433_v13 = vpop.f32.mrb[38].mxu1  ;;  %v5426_v2 = vld [vmem:[%s8769_s16 + $0x48] sm:$0xff] }
 0x8b6   :  { %6392 = vmatmul.mubr.msk.f32.vlgmr.msra.gmra.mrb[26].mxu0 %vm75_vm0, %v6343_v53  ;;  %7019 = vmatprep.subr.bf16.mxu0 %v7018_v8  ;;  %v3264_v14 = vpop.f32.mrb[39].mxu1  ;;  %v3410_v53 = vld [vmem:[%s8768_s15 + $0x18] sm:$0xf]  ;;  %v7072_v4 = vpack.c.bf16 %v5427_v3, %v5426_v2  ;;  %v5513_v2 = vld [vmem:[%s8768_s15 + $0xc0] sm:$0xff]  ;;  %v5514_v3 = vld [vmem:[%s8768_s15 + $0xc8] sm:$0xff] }
 0x8b7   :  { %7021 = vmatpush3.bf16.msra.mxu0 %v7018_v8  ;;  %6394 = vmatprep.mubr.msk.f32.mxu0 %vm75_vm0, %v2650_v63  ;;  %v5462_v63 = vld [vmem:[%s8768_s15 + $0x78] sm:$0xf]  ;;  %v7076_v8 = vpack.c.bf16 %v5429_v6, %v5428_v5  ;;  %v5533_v6 = vld [vmem:[%s8768_s15 + $0xe0] sm:$0xff] }
 0x8b8   :  { %7023 = vmatprep.subr.bf16.mxu0 %v7022_v10  ;;  %v5516_v5 = vld [vmem:[%s8768_s15 + $0xd8] sm:$0xf] }
 0x8b9   :  { %v6436_v17 = vpop.f32.mrb[40].mxu1 }
 0x8ba   :  { %6395 = vmatmul.mubr.msk.f32.gmra.mrb[28].mxu0 %vm75_vm0, %v6346_v60  ;;  %v3274_v18 = vpop.f32.mrb[41].mxu1  ;;  %v5417_v60 = vld [vmem:[%s8768_s15 + $0x30] sm:$0xff] }
 0x8bb   :  { %7025 = vmatpush3.bf16.msra.mxu0 %v7022_v10  ;;  %6421 = vmatprep.mubr.msk.f32.mxu0 %vm75_vm0, %v3053_v1  ;;  %v5481_v1 = vld [vmem:[%s8768_s15 + $0x88] sm:$0xff] }
 0x8bc   :  { %7027 = vmatprep.subr.bf16.mxu0 %v7026_v16  ;;  %v5430_v10 = vld [vmem:[%s8769_s16 + $0x68] sm:$0xff] }
 0x8bf   :  { %7029 = vmatpush3.bf16.msra.mxu0 %v7026_v16 }
 0x8c0   :  { %6419 = vmatprep.subr.mxu0 %v5384_v19 }
 0x8c3   :  { %6420 = vmatpush3.msra.mxu0 %v5384_v19 }
 0x8c4   :  { %6422 = vmatmul.mubr.msk.f32.vlgmr.msra.gmra.mrb[26].mxu0 %vm75_vm0, %v6403_v0  ;;  %7037 = vmatprep.subr.bf16.mxu0 %v7036_v24  ;;  %v5480_v0 = vld [vmem:[%s8768_s15 + $0x80] sm:$0xff] }
 0x8c5   :  { %7039 = vmatpush3.bf16.msra.mxu0 %v7036_v24  ;;  %6424 = vmatprep.mubr.msk.f32.mxu0 %vm75_vm0, %v3063_v9  ;;  %v5483_v9 = vld [vmem:[%s8768_s15 + $0x98] sm:$0xf] }
 0x8c6   :  { %7041 = vmatprep.subr.bf16.mxu0 %v7040_v25 }
 0x8c8   :  { %6425 = vmatmul.mubr.msk.f32.gmra.mrb[28].mxu0 %vm75_vm0, %v6406_v7  ;;  %v5482_v7 = vld [vmem:[%s8768_s15 + $0x90] sm:$0xff] }
 0x8c9   :  { %7043 = vmatpush3.bf16.msra.mxu0 %v7040_v25  ;;  %6451 = vmatprep.mubr.msk.f32.mxu0 %vm75_vm0, %v3264_v14  ;;  %v3512_v14 = vld [vmem:[%s8769_s16 + $0x8] sm:$0xff] }
 0x8ca   :  { %7045 = vmatprep.subr.bf16.mxu0 %v7044_v28 }
 0x8cd   :  { %7047 = vmatpush3.bf16.msra.mxu0 %v7044_v28  ;;  %v3514_v28 = vld [vmem:[%s8769_s16 + $0x18] sm:$0xff] }
 0x8ce   :  { %6449 = vmatprep.subr.mxu0 %v5404_v29 }
 0x8d1   :  { %6450 = vmatpush3.msra.mxu0 %v5404_v29 }
 0x8d2   :  { %6452 = vmatmul.mubr.msk.f32.vlgmr.msra.gmra.mrb[26].mxu0 %vm75_vm0, %v6433_v13  ;;  %v3511_v13 = vld [vmem:[%s8769_s16] sm:$0xff] }
 0x8d3   :  { %6454 = vmatprep.mubr.msk.f32.mxu0 %vm75_vm0, %v3274_v18  ;;  %v8446_v16 = vpack.c.bf16 %v3512_v14, %v3511_v13  ;;  %v5492_v18 = vld [vmem:[%s8768_s15 + $0xb8] sm:$0xf]  ;;  %v8672_v13 = vld [vmem:[%s8770_s17] ss:$0 sm:$0xff] }
 0x8d6   :  { %6455 = vmatmul.mubr.msk.f32.gmra.mrb[28].mxu0 %vm75_vm0, %v6436_v17  ;;  %v5491_v17 = vld [vmem:[%s8768_s15 + $0xb0] sm:$0xff] }
 0x8d7   :  { %6533 = vmatprep.mubr.msk.f32.mxu0 %vm284_vm4, %v5439_v31 }
 0x9a5   :  { %v6453_v33 = vpop.f32.mrb[26].mxu0 }
 0x9a6   :  { %v3400_v34 = vadd.f32 %v6453_v33, %v5409_v32  ;;  %v3369_v35 = vpop.f32.mrb[27].mxu0 }
 0x9a7   :  { %v3399_v36 = vadd.f32 %v5409_v32, %v3369_v35  ;;  %v3516_v35 = vld [vmem:[%s8769_s16 + $0x28] sm:$0xff] }
 0x9a8   :  { %v3404_v37 = vmax.f32 %v3400_v34, 0.0  ;;  %v3515_v34 = vld [vmem:[%s8769_s16 + $0x20] sm:$0xff] }
 0x9a9   :  { %v3403_v38 = vmax.f32 %v3399_v36, 0.0  ;;  %v6456_v40 = vpop.f32.mrb[28].mxu0 }
 0x9aa   :  { %v3402_v41 = vadd.f32 %v6456_v40, %v5409_v32  ;;  %v3379_v42 = vpop.f32.mrb[29].mxu0  ;;  %v8486_v40 = vpack.c.bf16 %v3516_v35, %v3515_v34 }
 0x9ab   :  { %v8287_v43 = vpack.c.bf16 %v3404_v37, %v3403_v38  ;;  %v3401_v44 = vadd.f32 %v5409_v32, %v3379_v42  ;;  %v8472_v32 = vpack.c.bf16 %v3514_v28, %v3513_v27 }
 0x9ac   :  { %v3406_v45 = vmax.f32 %v3402_v41, 0.0 }
 0x9ad   :  { %v3405_v46 = vmax.f32 %v3401_v44, 0.0  ;;  %7049 = vmatprep.subr.bf16.mxu1 %v8287_v43  ;;  %7093 = vmatprep.subr.bf16.mxu0 %v8287_v43 }
 0x9ae   :  { %7051 = vmatpush3.bf16.msra.mxu1 %v8287_v43  ;;  %7095 = vmatpush3.bf16.msra.mxu0 %v8287_v43 }
 0x9af   :  { %v8293_v48 = vpack.c.bf16 %v3406_v45, %v3405_v46  ;;  %v8500_v45 = vld [vmem:[%s8769_s16 + $0x30] sm:$0xff] }
 0x9b0   :  { %v5448_v46 = vld [vmem:[%s8769_s16 + $0x70] sm:$0xff] }
 0x9b1   :  { %7054 = vmatprep.subr.msk.bf16.mxu1 %vm7521_vm3, %v8293_v48  ;;  %7098 = vmatprep.subr.msk.bf16.mxu0 %vm7521_vm3, %v8293_v48 }
 0x9b2   :  { %7057 = vmatpush3.bf16.msk.msra.mxu1 %vm7521_vm3, %v8293_v48  ;;  %7101 = vmatpush3.bf16.msk.msra.mxu0 %vm7521_vm3, %v8293_v48 }
 0x9b3   :  { %7059 = vmatprep.subr.bf16.mxu1 %v8287_v43  ;;  %7115 = vmatprep.subr.bf16.mxu0 %v8287_v43 }
 0x9b5   :  { %6466 = vmatmul.mubr.msk.f32.vlgmr.msra.gmra.mrb[42].mxu1 %vm284_vm4, %v3408_v47  ;;  %6534 = vmatmul.mubr.msk.f32.vlgmr.msra.gmra.mrb[30].mxu0 %vm284_vm4, %v5440_v49  ;;  %v5449_v47 = vld [vmem:[%s8769_s16 + $0x78] sm:$0xff]  ;;  %v5450_v49 = vld [vmem:[%s8769_s16 + $0x80] sm:$0xff] }
 0x9b6   :  { %7061 = vmatpush3.bf16.msra.mxu1 %v8287_v43  ;;  %7117 = vmatpush3.bf16.msra.mxu0 %v8287_v43 }
 0x9b7   :  { %7064 = vmatprep.subr.msk.bf16.mxu1 %vm7521_vm3, %v8293_v48  ;;  %7120 = vmatprep.subr.msk.bf16.mxu0 %vm7521_vm3, %v8293_v48 }
 0x9b8   :  { %6468 = vmatprep.mubr.msk.f32.mxu1 %vm284_vm4, %v3409_v50  ;;  %6536 = vmatprep.mubr.msk.f32.mxu0 %vm284_vm4, %v5441_v39  ;;  %v5451_v50 = vld [vmem:[%s8769_s16 + $0x88] sm:$0xff]  ;;  %v8516_v39 = vpack.c.bf16 %v5449_v47, %v5448_v46 }
 0x9b9   :  { %6469 = vmatmul.mubr.msk.f32.gmra.mrb[44].mxu1 %vm284_vm4, %v3410_v53  ;;  %6537 = vmatmul.mubr.msk.f32.gmra.mrb[32].mxu0 %vm284_vm4, %v5442_v54  ;;  %v8518_v51 = vpack.c.bf16 %v5451_v50, %v5450_v49  ;;  %v5453_v53 = vld [vmem:[%s8769_s16 + $0x98] sm:$0xff] }
 0x9ba   :  { %7067 = vmatpush3.bf16.msk.msra.mxu1 %vm7521_vm3, %v8293_v48  ;;  %7123 = vmatpush3.bf16.msk.msra.mxu0 %vm7521_vm3, %v8293_v48  ;;  %v8532_v54 = vpack.c.bf16 %v5453_v53, %v5452_v52 }
 0x9bb   :  { %7137 = vmatprep.subr.bf16.mxu0 %v8287_v43  ;;  %6479 = vmatprep.mubr.msk.f32.mxu1 %vm284_vm4, %v5415_v55  ;;  %v8541_v55 = vld [vmem:[%s8769_s16 + $0xa0] sm:$0xff] }
 0x9bc   :  { %6567 = vmatprep.mubr.msk.f32.mxu0 %vm284_vm4, %v5459_v57  ;;  %7069 = vmatprep.subr.bf16.mxu1 %v7068_v56  ;;  %v5469_v57 = vld [vmem:[%s8769_s16 + $0xb0] sm:$0xff] }
 0x9bd   :  { %6480 = vmatmul.mubr.msk.f32.vlgmr.msra.gmra.mrb[46].mxu1 %vm284_vm4, %v5416_v58  ;;  %6568 = vmatmul.mubr.msk.f32.vlgmr.msra.gmra.mrb[34].mxu0 %vm284_vm4, %v5460_v59  ;;  %v5470_v58 = vld [vmem:[%s8769_s16 + $0xb8] sm:$0xff]  ;;  %v5471_v59 = vld [vmem:[%s8769_s16 + $0xc0] sm:$0xff] }
 0x9be   :  { %7139 = vmatpush3.bf16.msra.mxu0 %v8287_v43  ;;  %6482 = vmatprep.mubr.msk.f32.mxu1 %vm284_vm4, %v5417_v60 }
 0x9bf   :  { %7142 = vmatprep.subr.msk.bf16.mxu0 %vm7521_vm3, %v8293_v48  ;;  %6570 = vmatprep.mubr.msk.f32.mxu0 %vm284_vm4, %v5461_v61  ;;  %v8559_v61 = vpack.c.bf16 %v5471_v59, %v5470_v58 }
 0x9c0   :  { %7071 = vmatpush3.bf16.msra.mxu1 %v7068_v56 }
 0x9c1   :  { %6483 = vmatmul.mubr.msk.f32.gmra.mrb[48].mxu1 %vm284_vm4, %v5418_v62  ;;  %6571 = vmatmul.mubr.msk.f32.gmra.mrb[36].mxu0 %vm284_vm4, %v5462_v63  ;;  %v5472_v62 = vld [vmem:[%s8769_s16 + $0xc8] sm:$0xff]  ;;  %v5473_v63 = vld [vmem:[%s8769_s16 + $0xd0] sm:$0xff] }
 0x9c2   :  { %7145 = vmatpush3.bf16.msk.msra.mxu0 %vm7521_vm3, %v8293_v48  ;;  %6601 = vmatprep.mubr.msk.f32.mxu0 %vm284_vm4, %v5480_v0  ;;  %v8575_v0 = vpack.c.bf16 %v5473_v63, %v5472_v62 }
 0x9c3   :  { %7147 = vmatprep.subr.bf16.mxu0 %v8287_v43  ;;  %7073 = vmatprep.subr.bf16.mxu1 %v7072_v4 }
 0x9c4   :  { %7075 = vmatpush3.bf16.msra.mxu1 %v7072_v4 }
 0x9c5   :  { %6602 = vmatmul.mubr.msk.f32.vlgmr.msra.gmra.mrb[38].mxu0 %vm284_vm4, %v5481_v1  ;;  %7077 = vmatprep.subr.bf16.mxu1 %v7076_v8  ;;  %v8585_v1 = vld [vmem:[%s8769_s16 + $0xd8] sm:$0xff] }
 0x9c6   :  { %7149 = vmatpush3.bf16.msra.mxu0 %v8287_v43  ;;  %6604 = vmatprep.mubr.msk.f32.mxu0 %vm284_vm4, %v5482_v7  ;;  %v5535_v7 = vld [vmem:[%s8768_s15 + $0xf0] sm:$0xff] }
 0x9c7   :  { %7152 = vmatprep.subr.msk.bf16.mxu0 %vm7521_vm3, %v8293_v48 }
 0x9c8   :  { %7079 = vmatpush3.bf16.msra.mxu1 %v7076_v8 }
 0x9c9   :  { %6605 = vmatmul.mubr.msk.f32.gmra.mrb[40].mxu0 %vm284_vm4, %v5483_v9  ;;  %6497 = vmatprep.subr.mxu1 %v5430_v10 }
 0x9ca   :  { %7155 = vmatpush3.bf16.msk.msra.mxu0 %vm7521_vm3, %v8293_v48  ;;  %6615 = vmatprep.mubr.msk.f32.mxu0 %vm284_vm4, %v5489_v11 }
 0x9cb   :  { %7157 = vmatprep.subr.bf16.mxu0 %v7068_v56 }
 0x9cc   :  { %6498 = vmatpush3.msra.mxu1 %v5430_v10 }
 0x9cd   :  { %6616 = vmatmul.mubr.msk.f32.vlgmr.msra.gmra.mrb[42].mxu0 %vm284_vm4, %v5490_v12  ;;  %7081 = vmatprep.subr.bf16.mxu1 %v8446_v16 }
 0x9ce   :  { %7159 = vmatpush3.bf16.msra.mxu0 %v7068_v56  ;;  %6618 = vmatprep.mubr.msk.f32.mxu0 %vm284_vm4, %v5491_v17  ;;  %v5468_v56 = vld [vmem:[%s8769_s16 + $0xa8] sm:$0xff]  ;;  %s7371_s16 = smov [#allocation8]  }
 0x9cf   :  { %7161 = vmatprep.subr.bf16.mxu0 %v7072_v4  ;;  %v8557_v60 = vpack.c.bf16 %v5469_v57, %v5468_v56  ;;  %s5158_s14 = sshll.u32 %s7371_s16, 4  ;;  %s5159_s14 = int_to_ptr.vmem [resolvable:$true] %s5158_s14 }
 0x9d1   :  { %6619 = vmatmul.mubr.msk.f32.gmra.mrb[44].mxu0 %vm284_vm4, %v5492_v18 }
 0x9d2   :  { %7163 = vmatpush3.bf16.msra.mxu0 %v7072_v4  ;;  %v5515_v4 = vld [vmem:[%s8768_s15 + $0xd0] sm:$0xff] }
 0x9d3   :  { %7165 = vmatprep.subr.bf16.mxu0 %v7076_v8 }
 0x9d6   :  { %7167 = vmatpush3.bf16.msra.mxu0 %v7076_v8  ;;  %v5536_v8 = vld [vmem:[%s8768_s15 + $0xf8] sm:$0xf] }
 0x9d7   :  { %6633 = vmatprep.subr.mxu0 %v5430_v10 }
 0x9da   :  { %6634 = vmatpush3.msra.mxu0 %v5430_v10 }
 0x9db   :  { %7169 = vmatprep.subr.bf16.mxu0 %v8446_v16 }
 0xa88   :  { %v6467_v19 = vpop.f32.mrb[42].mxu1  ;;  %v8458_v20 = vpop.f32.mrb[30].mxu0 }
 0xa89   :  { %v3492_v21 = vpop.f32.mrb[43].mxu1  ;;  %v3905_v22 = vpop.f32.mrb[31].mxu0 }
 0xa8c   :  { %v6470_v23 = vpop.f32.mrb[44].mxu1  ;;  %v8460_v24 = vpop.f32.mrb[32].mxu0 }
 0xa8d   :  { %v3502_v25 = vpop.f32.mrb[45].mxu1  ;;  %v8462_v26 = vpop.f32.mrb[33].mxu0 }
 0xa90   :  { %v6481_v29 = vpop.f32.mrb[46].mxu1  ;;  %v8470_v30 = vpop.f32.mrb[34].mxu0 }
 0xa91   :  { %v3601_v31 = vpop.f32.mrb[47].mxu1  ;;  %v4116_v33 = vpop.f32.mrb[35].mxu0 }
 0xa92   :  { %6499 = vmatprep.mubr.msk.f32.mxu1 %vm75_vm0, %v3601_v31 }
 0xa93   :  { %6500 = vmatmul.mubr.msk.f32.vlgmr.msra.gmra.mrb[50].mxu1 %vm75_vm0, %v6481_v29 }
 0xa94   :  { %7083 = vmatpush3.bf16.msra.mxu1 %v8446_v16  ;;  %v6484_v36 = vpop.f32.mrb[48].mxu1  ;;  %v8483_v37 = vpop.f32.mrb[36].mxu0 }
 0xa95   :  { %v3611_v38 = vpop.f32.mrb[49].mxu1  ;;  %7085 = vmatprep.subr.bf16.mxu1 %v8472_v32  ;;  %v4126_v41 = vpop.f32.mrb[37].mxu0 }
 0xa96   :  { %6502 = vmatprep.mubr.msk.f32.mxu1 %vm75_vm0, %v3611_v38 }
 0xa97   :  { %6503 = vmatmul.mubr.msk.f32.gmra.mrb[52].mxu1 %vm75_vm0, %v6484_v36 }
 0xa98   :  { %7087 = vmatpush3.bf16.msra.mxu1 %v8472_v32  ;;  %6519 = vmatprep.mubr.msk.f32.mxu1 %vm75_vm0, %v3492_v21  ;;  %v8492_v42 = vpop.f32.mrb[38].mxu0 }
 0xa99   :  { %7089 = vmatprep.subr.bf16.mxu1 %v8486_v40  ;;  %v8495_v44 = vpop.f32.mrb[39].mxu0 }
 0xa9c   :  { %7091 = vmatpush3.bf16.msra.mxu1 %v8486_v40  ;;  %v6606_v15 = vpop.f32.mrb[40].mxu0 }
 0xa9d   :  { %6517 = vmatprep.subr.mxu1 %v8500_v45 }
 0xaa0   :  { %6518 = vmatpush3.msra.mxu1 %v8500_v45 }
 0xaa1   :  { %6520 = vmatmul.mubr.msk.f32.vlgmr.msra.gmra.mrb[50].mxu1 %vm75_vm0, %v6467_v19  ;;  %7103 = vmatprep.subr.bf16.mxu1 %v8516_v39 }
 0xaa2   :  { %6522 = vmatprep.mubr.msk.f32.mxu1 %vm75_vm0, %v3502_v25  ;;  %7105 = vmatpush3.bf16.msra.mxu1 %v8516_v39 }
 0xaa3   :  { %7107 = vmatprep.subr.bf16.mxu1 %v8518_v51 }
 0xaa5   :  { %6523 = vmatmul.mubr.msk.f32.gmra.mrb[52].mxu1 %vm75_vm0, %v6470_v23 }
 0xaa6   :  { %7109 = vmatpush3.bf16.msra.mxu1 %v8518_v51  ;;  %6553 = vmatprep.mubr.msk.f32.mxu1 %vm75_vm0, %v3905_v22 }
 0xaa7   :  { %7111 = vmatprep.subr.bf16.mxu1 %v8532_v54 }
 0xaaa   :  { %7113 = vmatpush3.bf16.msra.mxu1 %v8532_v54 }
 0xaab   :  { %6551 = vmatprep.subr.mxu1 %v8541_v55 }
 0xaae   :  { %6552 = vmatpush3.msra.mxu1 %v8541_v55 }
 0xaaf   :  { %6554 = vmatmul.mubr.msk.f32.vlgmr.msra.gmra.mrb[50].mxu1 %vm75_vm0, %v8458_v20  ;;  %7125 = vmatprep.subr.bf16.mxu1 %v8557_v60 }
 0xab0   :  { %7127 = vmatpush3.bf16.msra.mxu1 %v8557_v60  ;;  %6556 = vmatprep.mubr.msk.f32.mxu1 %vm75_vm0, %v8462_v26 }
 0xab1   :  { %7129 = vmatprep.subr.bf16.mxu1 %v8559_v61 }
 0xab3   :  { %6557 = vmatmul.mubr.msk.f32.gmra.mrb[52].mxu1 %vm75_vm0, %v8460_v24 }
 0xab4   :  { %7131 = vmatpush3.bf16.msra.mxu1 %v8559_v61  ;;  %6587 = vmatprep.mubr.msk.f32.mxu1 %vm75_vm0, %v4116_v33 }
 0xab5   :  { %7133 = vmatprep.subr.bf16.mxu1 %v8575_v0 }
 0xab8   :  { %7135 = vmatpush3.bf16.msra.mxu1 %v8575_v0 }
 0xab9   :  { %6585 = vmatprep.subr.mxu1 %v8585_v1 }
 0xabc   :  { %6586 = vmatpush3.msra.mxu1 %v8585_v1 }
 0xabd   :  { %6588 = vmatmul.mubr.msk.f32.vlgmr.msra.gmra.mrb[50].mxu1 %vm75_vm0, %v8470_v30  ;;  %7181 = vmatprep.subr.bf16.mxu1 %v8287_v43 }
 0xabe   :  { %7183 = vmatpush3.bf16.msra.mxu1 %v8287_v43  ;;  %6590 = vmatprep.mubr.msk.f32.mxu1 %vm75_vm0, %v4126_v41 }
 0xabf   :  { %7186 = vmatprep.subr.msk.bf16.mxu1 %vm7521_vm3, %v8293_v48 }
 0xac1   :  { %6591 = vmatmul.mubr.msk.f32.gmra.mrb[52].mxu1 %vm75_vm0, %v8483_v37 }
 0xac2   :  { %7189 = vmatpush3.bf16.msk.msra.mxu1 %vm7521_vm3, %v8293_v48  ;;  %6669 = vmatprep.mubr.msk.f32.mxu1 %vm284_vm4, %v5513_v2 }
 0xac3   :  { %7203 = vmatprep.subr.bf16.mxu1 %v8287_v43 }
 0xac5   :  { %6670 = vmatmul.mubr.msk.f32.vlgmr.msra.gmra.mrb[54].mxu1 %vm284_vm4, %v5514_v3 }
 0xac6   :  { %7205 = vmatpush3.bf16.msra.mxu1 %v8287_v43  ;;  %6672 = vmatprep.mubr.msk.f32.mxu1 %vm284_vm4, %v5515_v4  ;;  %v5534_v43 = vld [vmem:[%s8768_s15 + $0xe8] sm:$0xff] }
 0xac7   :  { %7208 = vmatprep.subr.msk.bf16.mxu1 %vm7521_vm3, %v8293_v48 }
 0xac9   :  { %6673 = vmatmul.mubr.msk.f32.gmra.mrb[56].mxu1 %vm284_vm4, %v5516_v5 }
 0xaca   :  { %7211 = vmatpush3.bf16.msk.msra.mxu1 %vm7521_vm3, %v8293_v48  ;;  %6703 = vmatprep.mubr.msk.f32.mxu1 %vm284_vm4, %v5533_v6  ;;  %v4369_v48 = vpop.f32.mrb[41].mxu0 }
 0xacb   :  { %v6617_v9 = vpop.f32.mrb[42].mxu0 }
 0xacc   :  { %v4468_v10 = vpop.f32.mrb[43].mxu0 }
 0xacd   :  { %6704 = vmatmul.mubr.msk.f32.vlgmr.msra.gmra.mrb[58].mxu1 %vm284_vm4, %v5534_v43  ;;  %6635 = vmatprep.mubr.msk.f32.mxu0 %vm75_vm0, %v4468_v10  ;;  %v6620_v11 = vpop.f32.mrb[44].mxu0 }
 0xace   :  { %6706 = vmatprep.mubr.msk.f32.mxu1 %vm284_vm4, %v5535_v7  ;;  %6636 = vmatmul.mubr.msk.f32.vlgmr.msra.gmra.mrb[46].mxu0 %vm75_vm0, %v6617_v9  ;;  %v4478_v12 = vpop.f32.mrb[45].mxu0 }
 0xacf   :  { %7171 = vmatpush3.bf16.msra.mxu0 %v8446_v16  ;;  %6638 = vmatprep.mubr.msk.f32.mxu0 %vm75_vm0, %v4478_v12 }
 0xad0   :  { %7173 = vmatprep.subr.bf16.mxu0 %v8472_v32 }
 0xad1   :  { %6707 = vmatmul.mubr.msk.f32.gmra.mrb[60].mxu1 %vm284_vm4, %v5536_v8 }
 0xad2   :  { %6639 = vmatmul.mubr.msk.f32.gmra.mrb[48].mxu0 %vm75_vm0, %v6620_v11 }
 0xad3   :  { %7175 = vmatpush3.bf16.msra.mxu0 %v8472_v32  ;;  %6655 = vmatprep.mubr.msk.f32.mxu0 %vm75_vm0, %v8495_v44 }
 0xad4   :  { %7177 = vmatprep.subr.bf16.mxu0 %v8486_v40 }
 0xad7   :  { %7179 = vmatpush3.bf16.msra.mxu0 %v8486_v40 }
 0xad8   :  { %6653 = vmatprep.subr.mxu0 %v8500_v45 }
 0xadb   :  { %6654 = vmatpush3.msra.mxu0 %v8500_v45 }
 0xadc   :  { %6656 = vmatmul.mubr.msk.f32.vlgmr.msra.gmra.mrb[46].mxu0 %vm75_vm0, %v8492_v42  ;;  %7191 = vmatprep.subr.bf16.mxu0 %v8516_v39 }
 0xadd   :  { %6658 = vmatprep.mubr.msk.f32.mxu0 %vm75_vm0, %v4369_v48  ;;  %7193 = vmatpush3.bf16.msra.mxu0 %v8516_v39 }
 0xade   :  { %7195 = vmatprep.subr.bf16.mxu0 %v8518_v51 }
 0xae0   :  { %6659 = vmatmul.mubr.msk.f32.gmra.mrb[48].mxu0 %vm75_vm0, %v6606_v15 }
 0xae1   :  { %7197 = vmatpush3.bf16.msra.mxu0 %v8518_v51 }
 0xae2   :  { %7199 = vmatprep.subr.bf16.mxu0 %v8532_v54 }
 0xae5   :  { %7201 = vmatpush3.bf16.msra.mxu0 %v8532_v54 }
 0xae6   :  { %6687 = vmatprep.subr.mxu0 %v8541_v55 }
 0xae9   :  { %6688 = vmatpush3.msra.mxu0 %v8541_v55 }
 0xaea   :  { %7213 = vmatprep.subr.bf16.mxu0 %v8557_v60 }
 0xb90   :  { %v6589_v14 = vpop.f32.mrb[50].mxu1 }
 0xb91   :  { %v4252_v16 = vadd.f32 %v6589_v14, %v8672_v13  ;;  %v4221_v17 = vpop.f32.mrb[51].mxu1 }
 0xb92   :  { %v4251_v18 = vadd.f32 %v8672_v13, %v4221_v17 }
 0xb93   :  { %v4256_v19 = vmul.f32 0.5, %v4252_v16 }
 0xb94   :  { %v4255_v20 = vmul.f32 0.5, %v4251_v18  ;;  %v6592_v21 = vpop.f32.mrb[52].mxu1 }
 0xb95   :  { %7294 = vtanh.f32 %v4256_v19  ;;  %v4254_v22 = vadd.f32 %v6592_v21, %v8672_v13  ;;  %v4231_v23 = vpop.f32.mrb[53].mxu1 }
 0xb96   :  { %7296 = vtanh.f32 %v4255_v20  ;;  %v4253_v24 = vadd.f32 %v8672_v13, %v4231_v23 }
 0xb97   :  { %v4258_v25 = vmul.f32 0.5, %v4254_v22 }
 0xb98   :  { %v4257_v26 = vmul.f32 0.5, %v4253_v24  ;;  %v6671_v27 = vpop.f32.mrb[54].mxu1 }
 0xb99   :  { %7298 = vtanh.f32 %v4258_v25  ;;  %v4771_v28 = vpop.f32.mrb[55].mxu1 }
 0xb9a   :  { %7300 = vtanh.f32 %v4257_v26  ;;  %6689 = vmatprep.mubr.msk.f32.mxu0 %vm75_vm0, %v4771_v28 }
 0xb9b   :  { %6690 = vmatmul.mubr.msk.f32.vlgmr.msra.gmra.mrb[46].mxu0 %vm75_vm0, %v6671_v27 }
 0xb9c   :  { %7215 = vmatpush3.bf16.msra.mxu0 %v8557_v60  ;;  %v6674_v29 = vpop.f32.mrb[56].mxu1 }
 0xb9d   :  { %7217 = vmatprep.subr.bf16.mxu0 %v8559_v61  ;;  %v4781_v30 = vpop.f32.mrb[57].mxu1 }
 0xb9e   :  { %6692 = vmatprep.mubr.msk.f32.mxu0 %vm75_vm0, %v4781_v30 }
 0xb9f   :  { %v7295_v31 = vpop.eup %7294  ;;  %6693 = vmatmul.mubr.msk.f32.gmra.mrb[48].mxu0 %vm75_vm0, %v6674_v29 }
 0xba0   :  { %v7297_v32 = vpop.eup %7296  ;;  %v4264_v33 = vadd.f32 1.0, %v7295_v31  ;;  %7219 = vmatpush3.bf16.msra.mxu0 %v8559_v61  ;;  %v6705_v34 = vpop.f32.mrb[58].mxu1 }
 0xba1   :  { %v4263_v35 = vadd.f32 1.0, %v7297_v32  ;;  %7221 = vmatprep.subr.bf16.mxu0 %v8575_v0  ;;  %v4981_v36 = vpop.f32.mrb[59].mxu1 }
 0xba2   :  { %v4268_v37 = vmul.f32 0.5, %v4264_v33  ;;  %6723 = vmatprep.mubr.msk.f32.mxu0 %vm75_vm0, %v4981_v36 }
 0xba3   :  { %v7299_v38 = vpop.eup %7298  ;;  %v4267_v40 = vmul.f32 0.5, %v4263_v35 }
 0xba4   :  { %v7301_v41 = vpop.eup %7300  ;;  %4272 = vst.msk [vmem:[%s8771_s18 + $0x8] sm:$0xff] %vm284_vm4, %v4268_v37  ;;  %v4266_v42 = vadd.f32 1.0, %v7299_v38  ;;  %7223 = vmatpush3.bf16.msra.mxu0 %v8575_v0  ;;  %v6708_v44 = vpop.f32.mrb[60].mxu1 }
 0xba5   :  { %4271 = vst.msk [vmem:[%s8771_s18] sm:$0xff] %vm284_vm4, %v4267_v40  ;;  %v4265_v45 = vadd.f32 1.0, %v7301_v41  ;;  %6721 = vmatprep.subr.mxu0 %v8585_v1  ;;  %v4991_v46 = vpop.f32.mrb[61].mxu1 }
 0xba6   :  { %v4270_v47 = vmul.f32 0.5, %v4266_v42 }
 0xba7   :  { %v4269_v49 = vmul.f32 0.5, %v4265_v45 }
 0xba8   :  { %4275 = vst.msk [vmem:[%s8771_s18 + $0x18] sm:$0xf] %vm4274_vm2, %v4270_v47  ;;  %6722 = vmatpush3.msra.mxu0 %v8585_v1 }
 0xba9   :  { %4273 = vst.msk [vmem:[%s8771_s18 + $0x10] sm:$0xff] %vm284_vm4, %v4269_v49  ;;  %6724 = vmatmul.mubr.msk.f32.vlgmr.msra.gmra.mrb[46].mxu0 %vm75_vm0, %v6705_v34 }
 0xbaa   :  { %6726 = vmatprep.mubr.msk.f32.mxu0 %vm75_vm0, %v4991_v46 }
 0xbad   :  { %6727 = vmatmul.mubr.msk.f32.gmra.mrb[48].mxu0 %vm75_vm0, %v6708_v44 }
 0xbae   :  { %7321 = shalt.err (!%p7318_p4)
}
 0xbaf   :  { %s7322_s3 = scalar_lea.hbm %s8772_s19, 32 }
 0xbb0   :  { %p7323_p5 = scmp.ne.s32.totalorder %s8772_s19, %s7322_s3  ;;  %p7326_p6 = scmp.lt.u32.totalorder %s7322_s3, %s8772_s19 }
 0xbb2   :  { %p7328_p7 = pnand %p7326_p6, %p7323_p5 }
 0xbb4   :  { %7331 = shalt.err (!%p7328_p7)
}
 0xbb5   :  { %5151 = dma.vmem_to_hbm [thread:$0]  %s5149_s27, 32, %s8772_s19, [#allocation7]  }
 0xbb6   :  { %s7332_s10 = scalar_lea.vmem %s5159_s14, 32  ;;  %p7337_p9 = scmp.lt.s32.totalorder %s5159_s14, %s5159_s14 }
 0xbb7   :  { %p7333_p8 = scmp.ne.s32.totalorder %s5159_s14, %s7332_s10  ;;  %p7338_p10 = scmp.lt.s32.totalorder %s7332_s10, %s7332_s10 }
 0xbb9   :  { %p7339_p11 = por %p7338_p10, %p7337_p9 }
 0xbbb   :  { %p7340_p12 = pnand %p7339_p11, %p7333_p8 }
 0xbbd   :  { %7343 = shalt.err (!%p7340_p12)
}
 0xbbe   :  { %s7344_s30 = scalar_lea.hbm %s8773_s20, 32 }
 0xbbf   :  { %p7345_p13 = scmp.ne.s32.totalorder %s8773_s20, %s7344_s30  ;;  %p7348_p0 = scmp.lt.u32.totalorder %s7344_s30, %s8773_s20 }
 0xbc1   :  { %p7350_p1 = pnand %p7348_p0, %p7345_p13 }
 0xbc3   :  { %7353 = shalt.err (!%p7350_p1)
}
 0xbc4   :  { %5161 = dma.vmem_to_hbm [thread:$0]  %s5159_s14, 32, %s8773_s20, [#allocation9]  }
 0xc7c   :  { %v6725_v50 = vpop.f32.mrb[46].mxu0 }
 0xc7d   :  { %v5116_v39 = vadd.f32 %v6725_v50, %v8672_v13  ;;  %v5085_v51 = vpop.f32.mrb[47].mxu0 }
 0xc7e   :  { %v5115_v52 = vadd.f32 %v8672_v13, %v5085_v51 }
 0xc7f   :  { %v5120_v53 = vmul.f32 0.5, %v5116_v39 }
 0xc80   :  { %v5119_v54 = vmul.f32 0.5, %v5115_v52  ;;  %v6728_v55 = vpop.f32.mrb[48].mxu0 }
 0xc81   :  { %7302 = vtanh.f32 %v5120_v53  ;;  %v5118_v56 = vadd.f32 %v6728_v55, %v8672_v13  ;;  %v5095_v57 = vpop.f32.mrb[49].mxu0 }
 0xc82   :  { %7304 = vtanh.f32 %v5119_v54  ;;  %v5117_v58 = vadd.f32 %v8672_v13, %v5095_v57 }
 0xc83   :  { %v5122_v59 = vmul.f32 0.5, %v5118_v56 }
 0xc84   :  { %v5121_v60 = vmul.f32 0.5, %v5117_v58 }
 0xc85   :  { %7306 = vtanh.f32 %v5122_v59 }
 0xc86   :  { %7308 = vtanh.f32 %v5121_v60 }
 0xc8b   :  { %v7303_v61 = vpop.eup %7302 }
 0xc8c   :  { %v7305_v62 = vpop.eup %7304  ;;  %v5128_v63 = vadd.f32 1.0, %v7303_v61 }
 0xc8d   :  { %v5127_v0 = vadd.f32 1.0, %v7305_v62 }
 0xc8e   :  { %v5132_v1 = vmul.f32 0.5, %v5128_v63 }
 0xc8f   :  { %v7307_v2 = vpop.eup %7306  ;;  %v5131_v3 = vmul.f32 0.5, %v5127_v0 }
 0xc90   :  { %v7309_v4 = vpop.eup %7308  ;;  %5555 = vst.msk [vmem:[%s8771_s18 + $0x28] sm:$0xff] %vm284_vm4, %v5132_v1  ;;  %v5130_v5 = vadd.f32 1.0, %v7307_v2 }
 0xc91   :  { %5554 = vst.msk [vmem:[%s8771_s18 + $0x20] sm:$0xff] %vm284_vm4, %v5131_v3  ;;  %v5129_v6 = vadd.f32 1.0, %v7309_v4 }
 0xc92   :  { %v5134_v43 = vmul.f32 0.5, %v5130_v5 }
 0xc93   :  { %v5133_v7 = vmul.f32 0.5, %v5129_v6 }
 0xc94   :  { %5557 = vst.msk [vmem:[%s8771_s18 + $0x38] sm:$0xf] %vm4274_vm2, %v5134_v43 }
 0xc95   :  { %5556 = vst.msk [vmem:[%s8771_s18 + $0x30] sm:$0xff] %vm284_vm4, %v5133_v7 }
 0xc96   :  { %7354 = dma.done.wait [#allocation7], 32  }
 0xc97   :  { %7355 = vsyncadd [#allocation7], 4294967264 }
 0xc98   :  { %7356 = dma.done.wait [#allocation9], 32  }
 0xc99   :  { %7357 = vsyncadd [#allocation9], 4294967264 }
 0xc9a   :  { %5170 = vsyncpa [#allocation7], 1 }
 0xc9b   :  { %5171 = vsyncpa [#allocation9], 1 }

</bundles_post_ra>
